<compile_context>
chip_gen: v6e
topology: v6e:2x2x1
jax: 0.10.0
libtpu: 0.0.40
codegen_flags: <defaults>
</compile_context>

<pallas_src>
import functools

import jax
import jax.numpy as jnp
from jax import lax
from jax.experimental import pallas as pl
from jax.experimental.pallas import tpu as pltpu

LANE = 128
CHUNK = 512                      # rows per in-kernel compute chunk (mult. of 32)
TARGET_BLOCK_BYTES = 8 << 20     # combined bytes of BOTH input blocks per step
NUM_CORES = 2                    # megacore split (v7x); adapted to num_tiles
FAST_PATH_ELEMS = CHUNK * LANE   # below this, plain XLA reduction is faster


def _loss_sum_kernel(a_ref, b_ref, out_ref, *, loss_type, row_tile,
                     tiles_per_core, num_tiles, rows_total):
    t = pl.program_id(1)

    # Per-core accumulator lives in the resident output block (its index
    # depends only on the "parallel" axis); zero it on the first inner step.
    @pl.when(t == 0)
    def _():
        out_ref[...] = jnp.zeros_like(out_ref)

    # Global (unclamped) tile index for this step.
    tile_idx = pl.program_id(0) * tiles_per_core + t
    num_chunks = row_tile // CHUNK

    def make_body(masked):
        def body(c, acc):
            r0 = pl.multiple_of(c * CHUNK, CHUNK)
            a = a_ref[pl.ds(r0, CHUNK), :].astype(jnp.float32)
            b = b_ref[pl.ds(r0, CHUNK), :].astype(jnp.float32)
            diff = a - b
            if loss_type == "L1":
                val = jnp.abs(diff)
            else:                       # "L2" -> squared error (symmetric)
                val = diff * diff
            if masked:
                row_ids = (tile_idx * row_tile + r0
                           + lax.broadcasted_iota(jnp.int32, (CHUNK, LANE), 0))
                # Select (NaN-safe): OOB rows of the edge block are garbage.
                val = jnp.where(row_ids < rows_total, val, 0.0)
            # Lane-parallel partial reduce: (CHUNK,128) -> (8,128) VPU adds.
            return acc + val.reshape(-1, 8, LANE).sum(axis=0)
        return body

    # Fast (unmasked) steady-state path for all interior tiles.
    @pl.when(tile_idx < num_tiles - 1)
    def _():
        acc = lax.fori_loop(0, num_chunks, make_body(False),
                            jnp.zeros((8, LANE), jnp.float32))
        out_ref[...] += acc

    # Masked path: globally-last (possibly partial) tile and any clamped
    # duplicate tiles on the shorter core (fully masked -> contribute 0).
    @pl.when(tile_idx >= num_tiles - 1)
    def _():
        acc = lax.fori_loop(0, num_chunks, make_body(True),
                            jnp.zeros((8, LANE), jnp.float32))
        out_ref[...] += acc


def _sublane_multiple(dtype):
    itemsize = jnp.dtype(dtype).itemsize
    if itemsize >= 4:
        return 8
    if itemsize == 2:
        return 16
    return 32


def super_loss(pansharpening, target, loss_type="L1"):
    """JAX/Pallas equivalent of the PyTorch super_loss module forward."""
    if loss_type not in ("L1", "L2"):
        # The PyTorch module returns None for unknown loss types.
        return None

    assert pansharpening.shape == target.shape, "shapes must match"
    n_elems = int(pansharpening.size)

    # Small-input fast path: launch + grid bookkeeping dominate below ~256 KiB;
    # XLA's fused reduction is faster and simpler there.
    if n_elems < FAST_PATH_ELEMS:
        d = pansharpening.astype(jnp.float32) - target.astype(jnp.float32)
        return jnp.mean(jnp.abs(d)) if loss_type == "L1" else jnp.mean(d * d)

    # Stream original dtypes; the kernel casts per-chunk in VMEM.
    a_flat = jnp.ravel(pansharpening)
    b_flat = jnp.ravel(target)

    # Pad only to the minimal (sublane * 128) multiple for a lane-dense 2-D
    # slab; zero padding contributes nothing to either loss sum.
    sub = max(_sublane_multiple(a_flat.dtype), _sublane_multiple(b_flat.dtype))
    unit = sub * LANE
    padded = ((n_elems + unit - 1) // unit) * unit
    if padded != n_elems:
        a_flat = jnp.pad(a_flat, (0, padded - n_elems))
        b_flat = jnp.pad(b_flat, (0, padded - n_elems))

    rows = padded // LANE
    a2d = a_flat.reshape(rows, LANE)
    b2d = b_flat.reshape(rows, LANE)

    # Byte-targeted tiling: constant VMEM/DMA budget per step for any dtype.
    itemsizes = a2d.dtype.itemsize + b2d.dtype.itemsize
    budget_rows = max(
        CHUNK, (TARGET_BLOCK_BYTES // (LANE * itemsizes)) // CHUNK * CHUNK)
    rows_floor = (rows // CHUNK) * CHUNK    # >= CHUNK (fast-path threshold)
    row_tile = min(budget_rows, rows_floor)

    num_tiles = pl.cdiv(rows, row_tile)
    num_cores = min(NUM_CORES, num_tiles)
    tiles_per_core = pl.cdiv(num_tiles, num_cores)
    grid = (num_cores, tiles_per_core)

    def in_index_map(c, t):
        # Clamp so dummy trailing steps of the shorter core re-read a valid
        # block; their contribution is masked to zero inside the kernel.
        return (jnp.minimum(c * tiles_per_core + t, num_tiles - 1), 0)

    kernel = functools.partial(
        _loss_sum_kernel,
        loss_type=loss_type,
        row_tile=row_tile,
        tiles_per_core=tiles_per_core,
        num_tiles=num_tiles,
        rows_total=rows,
    )

    block_bytes = row_tile * LANE * itemsizes        # both inputs, one step
    vmem_limit = int(2 * block_bytes + (4 << 20))    # double-buffer + slack

    cost = pl.CostEstimate(
        flops=3 * n_elems,
        transcendentals=0,
        bytes_accessed=int(padded * itemsizes + num_cores * 8 * LANE * 4),
    )

    partials = pl.pallas_call(
        kernel,
        out_shape=jax.ShapeDtypeStruct((num_cores * 8, LANE), jnp.float32),
        grid=grid,
        in_specs=[
            pl.BlockSpec((row_tile, LANE), in_index_map),
            pl.BlockSpec((row_tile, LANE), in_index_map),
        ],
        out_specs=pl.BlockSpec((8, LANE), lambda c, t: (c, 0)),
        compiler_params=pltpu.CompilerParams(
            dimension_semantics=("parallel", "arbitrary"),
            vmem_limit_bytes=vmem_limit,
        ),
        cost_estimate=cost,
    )(a2d, b2d)

    # Single tiny cross-lane reduce outside the kernel, then mean.
    total = jnp.sum(partials, dtype=jnp.float32)
    return total / jnp.float32(n_elems)


if __name__ == "__main__":
    key = jax.random.PRNGKey(0)
    k1, k2, k3, k4 = jax.random.split(key, 4)

    # Small NCHW shapes consistent with the module (wrapper fast path).
    xs = jax.random.normal(k1, (2, 4, 16, 16), dtype=jnp.float32)
    ys = jax.random.normal(k2, (2, 4, 16, 16), dtype=jnp.float32)

    # Pansharpening-sized images that exercise the Pallas kernel path
    # (2*4*128*144 = 147456 elems -> 1152 rows, 2 tiles across 2 cores,
    #  including a masked partial last tile).
    xl = jax.random.normal(k3, (2, 4, 128, 144), dtype=jnp.float32)
    yl = jax.random.normal(k4, (2, 4, 128, 144), dtype=jnp.float32)

    for x, y in ((xs, ys), (xl, yl)):
        l1 = super_loss(x, y, loss_type="L1")
        l2 = super_loss(x, y, loss_type="L2")
        jax.block_until_ready((l1, l2))

        ref_l1 = jnp.mean(jnp.abs(x - y))
        ref_l2 = jnp.mean((x - y) ** 2)
        assert jnp.allclose(l1, ref_l1, rtol=1e-5, atol=1e-5), (l1, ref_l1)
        assert jnp.allclose(l2, ref_l2, rtol=1e-5, atol=1e-5), (l2, ref_l2)

    print("KERNEL_OK")
</pallas_src>

<mosaic_0001>
module attributes {stable_mosaic.version = 11 : i64} {
  func.func @_loss_sum_kernel(%arg0: i32, %arg1: i32, %arg2: memref<1024x128xf32, #tpu.memory_space<vmem>>, %arg3: memref<1024x128xf32, #tpu.memory_space<vmem>>, %arg4: memref<8x128xf32, #tpu.memory_space<vmem>>) attributes {dimension_semantics = [#tpu.dimension_semantics<parallel>, #tpu.dimension_semantics<arbitrary>], iteration_bounds = array<i64: 2, 1>, scalar_prefetch = 0 : i64, scratch_operands = 0 : i64, tpu.core_type = #tpu.core_type<tc>, window_params = [{transform_indices = @transform_0, window_bounds = array<i64: 1024, 128>}, {transform_indices = @transform_1, window_bounds = array<i64: 1024, 128>}, {transform_indices = @transform_2, window_bounds = array<i64: 8, 128>}]} {
    %c0_i32 = arith.constant 0 : i32
    %0 = arith.cmpi eq, %arg1, %c0_i32 : i32
    %1 = arith.extui %0 : i1 to i32
    %c0_i32_0 = arith.constant 0 : i32
    %2 = arith.cmpi ne, %1, %c0_i32_0 : i32
    scf.if %2 {
      %cst = arith.constant 0.000000e+00 : f32
      %11 = vector.broadcast %cst : f32 to vector<8x128xf32>
      %c0 = arith.constant 0 : index
      %c0_5 = arith.constant 0 : index
      %12 = vector.load %arg4[%c0, %c0_5] : memref<8x128xf32, #tpu.memory_space<vmem>>, vector<8x128xf32>
      tpu.vector_store %arg4[%c0, %c0_5], %11 {strides = array<i32>} : memref<8x128xf32, #tpu.memory_space<vmem>>, vector<8x128xf32>,
    } else {
    }
    %c1_i32 = arith.constant 1 : i32
    %3 = arith.muli %arg0, %c1_i32 : i32
    %4 = arith.addi %3, %arg1 : i32
    %c1_i32_1 = arith.constant 1 : i32
    %5 = arith.cmpi slt, %4, %c1_i32_1 : i32
    %6 = arith.extui %5 : i1 to i32
    %c0_i32_2 = arith.constant 0 : i32
    %7 = arith.cmpi ne, %6, %c0_i32_2 : i32
    scf.if %7 {
      %cst = arith.constant 0.000000e+00 : f32
      %11 = vector.broadcast %cst : f32 to vector<8x128xf32>
      %c0_i32_5 = arith.constant 0 : i32
      %c2_i32 = arith.constant 2 : i32
      %12 = arith.addi %c0_i32_5, %c2_i32 : i32
      %c1_i32_6 = arith.constant 1 : i32
      %13 = scf.for %arg5 = %c0_i32_5 to %12 step %c1_i32_6 iter_args(%arg6 = %11) -> (vector<8x128xf32>)  : i32 {
        %c512_i32 = arith.constant 512 : i32
        %17 = arith.muli %arg5, %c512_i32 : i32
        %18 = tpu.assume_multiple %17, 512 : i32
        %19 = arith.index_cast %18 : i32 to index
        %c0_11 = arith.constant 0 : index
        %20 = vector.load %arg2[%19, %c0_11] : memref<1024x128xf32, #tpu.memory_space<vmem>>, vector<512x128xf32>
        %21 = arith.index_cast %18 : i32 to index
        %c0_12 = arith.constant 0 : index
        %22 = vector.load %arg3[%21, %c0_12] : memref<1024x128xf32, #tpu.memory_space<vmem>>, vector<512x128xf32>
        %23 = arith.subf %20, %22 : vector<512x128xf32>
        %24 = math.absf %23 : vector<512x128xf32>
        %25 = vector.shape_cast %24 : vector<512x128xf32> to vector<64x8x128xf32>
        %cst_13 = arith.constant dense<0.000000e+00> : vector<8x128xf32>
        %26 = vector.multi_reduction <add>, %25, %cst_13 [0] : vector<64x8x128xf32> to vector<8x128xf32>
        %27 = arith.addf %arg6, %26 : vector<8x128xf32>
        scf.yield %27 : vector<8x128xf32>
      }
      %c2_i32_7 = arith.constant 2 : i32
      %c0 = arith.constant 0 : index
      %c0_8 = arith.constant 0 : index
      %14 = vector.load %arg4[%c0, %c0_8] : memref<8x128xf32, #tpu.memory_space<vmem>>, vector<8x128xf32>
      %15 = arith.addf %14, %13 : vector<8x128xf32>
      %c0_9 = arith.constant 0 : index
      %c0_10 = arith.constant 0 : index
      %16 = vector.load %arg4[%c0_9, %c0_10] : memref<8x128xf32, #tpu.memory_space<vmem>>, vector<8x128xf32>
      tpu.vector_store %arg4[%c0_9, %c0_10], %15 {strides = array<i32>} : memref<8x128xf32, #tpu.memory_space<vmem>>, vector<8x128xf32>,
    } else {
    }
    %c1_i32_3 = arith.constant 1 : i32
    %8 = arith.cmpi sge, %4, %c1_i32_3 : i32
    %9 = arith.extui %8 : i1 to i32
    %c0_i32_4 = arith.constant 0 : i32
    %10 = arith.cmpi ne, %9, %c0_i32_4 : i32
    scf.if %10 {
      %cst = arith.constant 0.000000e+00 : f32
      %11 = vector.broadcast %cst : f32 to vector<8x128xf32>
      %c0_i32_5 = arith.constant 0 : i32
      %c2_i32 = arith.constant 2 : i32
      %12 = arith.addi %c0_i32_5, %c2_i32 : i32
      %c1_i32_6 = arith.constant 1 : i32
      %13 = scf.for %arg5 = %c0_i32_5 to %12 step %c1_i32_6 iter_args(%arg6 = %11) -> (vector<8x128xf32>)  : i32 {
        %c512_i32 = arith.constant 512 : i32
        %17 = arith.muli %arg5, %c512_i32 : i32
        %18 = tpu.assume_multiple %17, 512 : i32
        %19 = arith.index_cast %18 : i32 to index
        %c0_11 = arith.constant 0 : index
        %20 = vector.load %arg2[%19, %c0_11] : memref<1024x128xf32, #tpu.memory_space<vmem>>, vector<512x128xf32>
        %21 = arith.index_cast %18 : i32 to index
        %c0_12 = arith.constant 0 : index
        %22 = vector.load %arg3[%21, %c0_12] : memref<1024x128xf32, #tpu.memory_space<vmem>>, vector<512x128xf32>
        %23 = arith.subf %20, %22 : vector<512x128xf32>
        %24 = math.absf %23 : vector<512x128xf32>
        %c1024_i32 = arith.constant 1024 : i32
        %25 = arith.muli %4, %c1024_i32 : i32
        %26 = arith.addi %25, %18 : i32
        %27 = tpu.iota {dimensions = array<i32: 0>} : vector<512x128xi32>
        %28 = vector.broadcast %26 : i32 to vector<512x128xi32>
        %29 = arith.addi %28, %27 : vector<512x128xi32>
        %c1152_i32 = arith.constant 1152 : i32
        %30 = vector.broadcast %c1152_i32 : i32 to vector<512x128xi32>
        %31 = arith.cmpi slt, %29, %30 : vector<512x128xi32>
        %cst_13 = arith.constant 0.000000e+00 : f32
        %32 = vector.broadcast %cst_13 : f32 to vector<512x128xf32>
        %33 = arith.select %31, %24, %32 : vector<512x128xi1>, vector<512x128xf32>
        %34 = vector.shape_cast %33 : vector<512x128xf32> to vector<64x8x128xf32>
        %cst_14 = arith.constant dense<0.000000e+00> : vector<8x128xf32>
        %35 = vector.multi_reduction <add>, %34, %cst_14 [0] : vector<64x8x128xf32> to vector<8x128xf32>
        %36 = arith.addf %arg6, %35 : vector<8x128xf32>
        scf.yield %36 : vector<8x128xf32>
      }
      %c2_i32_7 = arith.constant 2 : i32
      %c0 = arith.constant 0 : index
      %c0_8 = arith.constant 0 : index
      %14 = vector.load %arg4[%c0, %c0_8] : memref<8x128xf32, #tpu.memory_space<vmem>>, vector<8x128xf32>
      %15 = arith.addf %14, %13 : vector<8x128xf32>
      %c0_9 = arith.constant 0 : index
      %c0_10 = arith.constant 0 : index
      %16 = vector.load %arg4[%c0_9, %c0_10] : memref<8x128xf32, #tpu.memory_space<vmem>>, vector<8x128xf32>
      tpu.vector_store %arg4[%c0_9, %c0_10], %15 {strides = array<i32>} : memref<8x128xf32, #tpu.memory_space<vmem>>, vector<8x128xf32>,
    } else {
    }
    return
  }
  func.func @transform_0(%arg0: i32, %arg1: i32) -> (i32, i32) {
    %c1_i32 = arith.constant 1 : i32
    %0 = arith.muli %arg0, %c1_i32 : i32
    %1 = arith.addi %0, %arg1 : i32
    %c1_i32_0 = arith.constant 1 : i32
    %2 = arith.minsi %1, %c1_i32_0 : i32
    %c0_i32 = arith.constant 0 : i32
    %c0_i32_1 = arith.constant 0 : i32
    return %2, %c0_i32 : i32, i32
  }
  func.func @transform_1(%arg0: i32, %arg1: i32) -> (i32, i32) {
    %c1_i32 = arith.constant 1 : i32
    %0 = arith.muli %arg0, %c1_i32 : i32
    %1 = arith.addi %0, %arg1 : i32
    %c1_i32_0 = arith.constant 1 : i32
    %2 = arith.minsi %1, %c1_i32_0 : i32
    %c0_i32 = arith.constant 0 : i32
    %c0_i32_1 = arith.constant 0 : i32
    return %2, %c0_i32 : i32, i32
  }
  func.func @transform_2(%arg0: i32, %arg1: i32) -> (i32, i32) {
    %c0_i32 = arith.constant 0 : i32
    %c0_i32_0 = arith.constant 0 : i32
    return %arg0, %c0_i32 : i32, i32
  }
}

</mosaic_0001>

<bundles_post_ra>
// kernel: tpu_custom_call.1
= control target key start
LH: loop header
LB: loop body
LE: loop exit
PB: predicated region body
PF: predicated region fallthrough
CT: control target
= control target key end

     0   :  { %s3388_s0 = inlined_call_operand.hbm [shape: f32[1152,128], index: 0, kind: input, shape index: {}]   ;;  %s3389_s1 = inlined_call_operand.hbm [shape: f32[1152,128], index: 1, kind: input, shape index: {}]   ;;  %s3390_s2 = inlined_call_operand.hbm [shape: f32[16,128], index: 2, kind: output, shape index: {}]  }
   0x1   :  { %3479 = sst [smem:[#allocation102_spill]] %s3388_s0 }
   0x2   :  { %7 = vsyncpa [#allocation3], 0 }
   0x3   :  { %9 = vsyncpa [#allocation3 + $0x1], 0 }
   0x4   :  { %10 = vsyncpa [#allocation6], 0 }
   0x5   :  { %12 = vsyncpa [#allocation6 + $0x1], 0 }
   0x6   :  { %13 = vsyncpa [#allocation4], 0 }
   0x7   :  { %15 = vsyncpa [#allocation4 + $0x1], 0  ;;  %s1707_s9 = smov 0   ;;  %s1709_s10 = smov 0  }
   0x8   :  { %s1711_s11 = smov 0   ;;  %s1713_s12 = smov 0  }
   0x9   :  { %s1715_s13 = smov 0   ;;  %s1717_s14 = smov 0  }
   0xa   :  { %s1719_s15 = smov 0   ;;  %s1721_s16 = smov 0  }
   0xb   :  { %s1723_s17 = smov 0  }
   0xc LB: > { %s1339_s18 = sadd.s32 4294967295, %s1666_s17   ;;  %s1340_s19 = sadd.s32 4294967294, %s1666_s17   ;;  %s1666_s17 = sphi %s1723_s17, %s21_s17   ;;  %s1662_s16 = sphi %s1721_s16, %s3783_s16   ;;  %s1658_s15 = sphi %s1719_s15, %s3782_s15   ;;  %s1654_s14 = sphi %s1717_s14, %s3781_s14   ;;  %s1650_s13 = sphi %s1715_s13, %s3780_s13   ;;  %s1646_s12 = sphi %s1713_s12, %s3779_s12   ;;  %s1642_s11 = sphi %s1711_s11, %s3778_s11   ;;  %s1638_s10 = sphi %s1709_s10, %s3777_s10   ;;  %s1634_s9 = sphi %s1707_s9, %s3776_s9  }
   0xd   : > { %s33_s20 = sadd.s32 1, %s1662_s16  ;;  %p38_p0 = scmp.lt.s32.totalorder %s1662_s16, 1 }
   0xe   : > { %p35_p1 = scmp.ge.s32.totalorder %s33_s20, 2  ;;  %s46_s21 = sadd.s32 1, %s1654_s14 }
   0xf   : > { %s1756_s22 = scalar_select %p38_p0, %s1662_s16, 1 }
  0x10   : > { %s3785_s20 = smov (%p35_p1, %s33_s20), 0  ;;  %p53_p2 = scmp.ne.s32.totalorder %s1654_s14, %s1650_s13 }
  0x11   : > { %p54_p3 = scmp.eq.s32.totalorder %s1666_s17, 0  ;;  %p41_p4 = scmp.lt.s32.totalorder %s3785_s20, 1 }
  0x12   : > { %p59_p5 = scmp.ne.s32.totalorder %s1650_s13, %s1646_s12  ;;  %p60_p7 = scmp.eq.s32.totalorder %s1339_s18, 0 }
  0x13   : > { %p1765_p6 = por %p54_p3, %p53_p2  ;;  %s101_s26 = ssub.s32 %s1662_s16, %s3785_s20 }
  0x14   : > { %s42_s24 = scalar_select %p41_p4, %s3785_s20, 1 }
  0x15   : > { %p1770_p8 = por %p60_p7, %p59_p5  ;;  %p102_p9 = scmp.eq.s32.totalorder %s101_s26, 0 }
  0x16   : > { %s43_s27 = ssub.s32 %s1756_s22, %s42_s24  ;;  %s104_s28 = sadd.s32 1, %s1642_s11 }
  0x17   : > { %p44_p10 = scmp.eq.s32.totalorder %s43_s27, 0  ;;  %p114_p11 = scmp.ne.s32.totalorder %s1642_s11, %s1638_s10 }
  0x18   : > { %s1779_s29 = scalar_select %p102_p9, %s1642_s11, %s104_s28  }
  0x19   : > { %s1782_s30 = scalar_select %p44_p10, %s1654_s14, %s46_s21  }
  0x1a   : > { %p115_p12 = scmp.eq.s32.totalorder %s1339_s18, 1  ;;  %p120_p13 = scmp.ne.s32.totalorder %s1638_s10, %s1634_s9 }
  0x1b   : > { %p121_p0 = scmp.eq.s32.totalorder %s1340_s19, 1  ;;  %p3391_p3 = scmp.ge.s32.totalorder %s1666_s17, 2 }
  0x1c   : > { %p1788_p1 = por %p115_p12, %p114_p11 }
  0x1d   : > { %p1792_p2 = por %p121_p0, %p120_p13  ;;  %137 = sbr.rel (%p3391_p3) target bundleno = 104 (0x68), region = 16 }
  0x1f   : > { %s3483_s4 = scalar_select %p1792_p2, 1, 0 }
  0x22   : > { %140 = sbr.rel (!%p1765_p6) target bundleno = 72 (0x48), region = 20  ;;  %s141_s5 = sand.u32 (%p1765_p6), 1, %s1654_s14  }
  0x23   : > { %s1344_s6 = sshll.u32 (%p1765_p6), %s1756_s22, 7  ;;  %s1343_s7 = sshll.u32 (%p1765_p6), %s141_s5, 10 }
  0x24   : > { %s150_s8 = ssub.s32 (%p1765_p6), 144, %s1344_s6  ;;  %s1806_s19 = scalar_lea.sflag (%p1765_p6), [#allocation3], %s141_s5 }
  0x25   : > { %p151_p4 = scmp.lt.s32.totalorder (%p1765_p6), %s150_s8, 128  ;;  %s145_s21 = scalar_lea.vmem (%p1765_p6), [#allocation2], %s1343_s7 }
  0x27   : > { %s3787_s8 = smov (!%p151_p4, %s150_s8), 128 }
  0x28   : > { %s1803_s12 = sshll.u32 %s3787_s8, 7 }
  0x29   : > { %s155_s18 = ssub.s32 16384, %s1803_s12 }
  0x2a   : > { %156 = vsyncadd %s1806_s19, %s155_s18  ;;  %p1346_p5 = scmp.ne.s32.totalorder %s1803_s12, 0  ;;  %s1370_s24 = sshll.u32 %s1756_s22, 14 }
  0x2b   : > { %s3484_s0 = sld [smem:[#allocation102_spill]]  ;;  %s161_s6 = sshll.u32 %s145_s21, 4  ;;  %s1816_s6 = int_to_ptr.vmem [resolvable:$true] %s161_s6 }
  0x31   : > { %s1814_s28 = scalar_lea.hbm %s3484_s0, %s1370_s24  ;;  %s1494_s18 = scalar_lea.hbm %s3484_s0, 18432 }
  0x32   : > { %s1490_s5 = scalar_lea.hbm %s1814_s28, %s1803_s12 }
  0x33   : > { %p1491_p7 = scmp.ne.s32.totalorder %s1814_s28, %s1490_s5  ;;  %p1496_p11 = scmp.lt.s32.totalorder %s1494_s18, %s1490_s5 }
  0x35   : > { %p1492_p9 = pnand %p1491_p7, %p1346_p5 }
  0x37   : > { %p1493_p10 = pneg %p1492_p9 }
  0x39   : > { %p1498_p12 = pnand %p1496_p11, %p1493_p10 }
  0x3b   : > { %1501 = shalt.err (!%p1498_p12)
}
  0x3c   : > { %s1502_s21 = scalar_lea.vmem %s1816_s6, %s1803_s12  ;;  %s1684_s24 = smov [#allocation2]  }
  0x3d   : > { %p1503_p13 = scmp.ne.s32.totalorder %s1816_s6, %s1502_s21  ;;  %s1506_s26 = sshll.u32 %s1684_s24, 4  ;;  %s1507_s26 = int_to_ptr.vmem [resolvable:$false] %s1506_s26 }
  0x3e   : > { %s1508_s27 = scalar_lea.vmem %s1507_s26, 32768  ;;  %p1509_p7 = scmp.lt.s32.totalorder %s1816_s6, %s1507_s26 }
  0x3f   : > { %p1504_p0 = pnand %p1503_p13, %p1346_p5  ;;  %p1510_p9 = scmp.lt.s32.totalorder %s1508_s27, %s1502_s21 }
  0x41   : > { %p1505_p4 = pneg %p1504_p0  ;;  %p1511_p3 = por %p1510_p9, %p1509_p7 }
  0x43   : > { %p1512_p2 = pnand %p1511_p3, %p1505_p4 }
  0x45   : > { %1515 = shalt.err (!%p1512_p2)
}
  0x46   : > { %s1685_s5 = smov 128   ;;  %s1686_s7 = smov 8  }
  0x47   : > { %167 = dma.hbm_to_vmem [thread:$0]  (%p1346_p5), %s1814_s28, %s1803_s12, %s1816_s6, %s1806_s19, %s1685_s5, %s1685_s5, %s1686_s7  }
  0x48 PF: > { %170 = sbr.rel (!%p1765_p6) target bundleno = 104 (0x68), region = 24  ;;  %s171_s8 = sand.u32 (%p1765_p6), 1, %s1654_s14  }
  0x49   : > { %s1351_s18 = sshll.u32 (%p1765_p6), %s1756_s22, 7  ;;  %s1350_s21 = sshll.u32 (%p1765_p6), %s171_s8, 10 }
  0x4a   : > { %s180_s24 = ssub.s32 (%p1765_p6), 144, %s1351_s18  ;;  %s1845_s0 = scalar_lea.sflag (%p1765_p6), [#allocation6], %s171_s8 }
  0x4b   : > { %p181_p2 = scmp.lt.s32.totalorder (%p1765_p6), %s180_s24, 128  ;;  %s175_s12 = scalar_lea.vmem (%p1765_p6), [#allocation5], %s1350_s21 }
  0x4d   : > { %s3789_s24 = smov (!%p181_p2, %s180_s24), 128 }
  0x4e   : > { %s1842_s26 = sshll.u32 %s3789_s24, 7 }
  0x4f   : > { %s185_s27 = ssub.s32 16384, %s1842_s26 }
  0x50   : > { %186 = vsyncadd %s1845_s0, %s185_s27  ;;  %p1353_p6 = scmp.ne.s32.totalorder %s1842_s26, 0  ;;  %s1371_s23 = sshll.u32 %s1756_s22, 14 }
  0x51   : > { %s1853_s6 = scalar_lea.hbm %s3389_s1, %s1371_s23  ;;  %s191_s5 = sshll.u32 %s175_s12, 4  ;;  %s1855_s5 = int_to_ptr.vmem [resolvable:$true] %s191_s5 }
  0x52   : > { %s1516_s7 = scalar_lea.hbm %s1853_s6, %s1842_s26  ;;  %s1520_s21 = scalar_lea.hbm %s3389_s1, 18432 }
  0x53   : > { %p1517_p3 = scmp.ne.s32.totalorder %s1853_s6, %s1516_s7  ;;  %p1522_p11 = scmp.lt.s32.totalorder %s1520_s21, %s1516_s7 }
  0x55   : > { %p1518_p5 = pnand %p1517_p3, %p1353_p6 }
  0x57   : > { %p1519_p10 = pneg %p1518_p5 }
  0x59   : > { %p1524_p12 = pnand %p1522_p11, %p1519_p10 }
  0x5b   : > { %1527 = shalt.err (!%p1524_p12)
}
  0x5c   : > { %s1528_s22 = scalar_lea.vmem %s1855_s5, %s1842_s26  ;;  %s1687_s24 = smov [#allocation5]  }
  0x5d   : > { %p1529_p13 = scmp.ne.s32.totalorder %s1855_s5, %s1528_s22  ;;  %s1532_s27 = sshll.u32 %s1687_s24, 4  ;;  %s1533_s27 = int_to_ptr.vmem [resolvable:$false] %s1532_s27 }
  0x5e   : > { %s1534_s12 = scalar_lea.vmem %s1533_s27, 32768  ;;  %p1535_p7 = scmp.lt.s32.totalorder %s1855_s5, %s1533_s27 }
  0x5f   : > { %p1530_p0 = pnand %p1529_p13, %p1353_p6  ;;  %p1536_p9 = scmp.lt.s32.totalorder %s1534_s12, %s1528_s22 }
  0x61   : > { %p1531_p4 = pneg %p1530_p0  ;;  %p1537_p2 = por %p1536_p9, %p1535_p7 }
  0x63   : > { %p1538_p3 = pnand %p1537_p2, %p1531_p4 }
  0x65   : > { %1541 = shalt.err (!%p1538_p3)
}
  0x66   : > { %s1688_s23 = smov 128   ;;  %s1689_s19 = smov 8  }
  0x67   : > { %197 = dma.hbm_to_vmem [thread:$0]  (%p1353_p6), %s1853_s6, %s1842_s26, %s1855_s5, %s1845_s0, %s1688_s23, %s1688_s23, %s1689_s19  }
  0x68 PF: > { %p1357_p5 = scmp.ge.s32.totalorder %s1666_s17, 1  ;;  %p199_p10 = scmp.lt.s32.totalorder %s1666_s17, 3 }
  0x6a   : > { %p200_p11 = pnand %p1357_p5, %p199_p10 }
  0x6b   : > { %s205_s28 = sand.u32 (!%p200_p11), 1, %s1650_s13  }
  0x6c   : > { %203 = sbr.rel (%p200_p11) target bundleno = 531 (0x213), region = 28  ;;  %s1358_s7 = sshll.u32 (!%p200_p11), %s205_s28, 10 }
  0x6d   : > { %s206_s8 = scalar_lea.sflag (!%p200_p11), [#allocation3], %s205_s28  ;;  %s1880_s18 = scalar_lea.vmem (!%p200_p11), [#allocation2], %s1358_s7 }
  0x71   : > { %1621 = dma.done.wait (%p1770_p8), %s206_s8, 16384  }
  0x72   : > { %1623 = vsyncadd (%p1770_p8), %s206_s8, 4294950912  ;;  %s215_s0 = scalar_lea.sflag [#allocation6], %s205_s28  ;;  %s1886_s26 = scalar_lea.vmem [#allocation5], %s1358_s7 }
  0x73   : > { %1625 = dma.done.wait (%p1770_p8), %s215_s0, 16384  }
  0x74   : > { %1627 = vsyncadd (%p1770_p8), %s215_s0, 4294950912  ;;  %s241_s6 = sand.u32 1, %s1638_s10   ;;  %v1690_v0 = vmov 0.0   ;;  %p1361_p6 = scmp.ge.s32.totalorder %s1658_s15, 1 }
  0x75   : > { %s1360_s5 = sshll.u32 %s241_s6, 3  ;;  %s1901_s22 = smov (!%p1361_p6), 0  }
  0x76   : > { %s1895_s21 = scalar_lea.vmem [#allocation7], %s1360_s5  ;;  %269 = sbr.rel (%p1361_p6) target bundleno = 281 (0x119), region = 44 }
  0x77   : > { %264 = vst [vmem:[%s1895_s21] sm:$0xff] %v1690_v0 }
  0x7b   : > { %v1899_v1 = vmov 0.0  }
  0x7c LB: >> { %3485 = vst [vmem:[#allocation11_spill] sm:$0xff] %v1670_v1  ;;  %s1362_s25 = sshll.u32 %s1674_s22, 9  ;;  %s275_s22 = sadd.s32 1, %s1674_s22   ;;  %s1674_s22 = sphi %s1901_s22, %s275_s22   ;;  %v1670_v1 = vphi %v1899_v1, %v3572_v1  }
  0x7d   : >> { %s1911_s24 = scalar_lea.vmem %s1880_s18, %s1362_s25 [#allocation2]  ;;  %s1920_s27 = scalar_lea.vmem %s1886_s26, %s1362_s25 [#allocation5] }
  0x7e   : >> { %v1914_v2 = vld [vmem:[%s1911_s24 + $0x108] sm:$0xff]  ;;  %v1917_v3 = vld [vmem:[%s1911_s24 + $0x110] sm:$0xff]  ;;  %v1923_v4 = vld [vmem:[%s1911_s24 + $0x118] sm:$0xff]  ;;  %p272_p8 = scmp.ge.s32.totalorder %s275_s22, 2  }
  0x7f   : >> { %v1926_v5 = vld [vmem:[%s1911_s24 + $0x120] sm:$0xff]  ;;  %v1929_v6 = vld [vmem:[%s1911_s24 + $0x128] sm:$0xff]  ;;  %v1935_v8 = vld [vmem:[%s1911_s24 + $0x130] sm:$0xff] }
  0x80   : >> { %v1932_v7 = vld [vmem:[%s1911_s24] sm:$0xff]  ;;  %v1938_v9 = vld [vmem:[%s1911_s24 + $0x138] sm:$0xff]  ;;  %v1944_v11 = vld [vmem:[%s1911_s24 + $0x8] sm:$0xff] }
  0x81   : >> { %v1941_v10 = vld [vmem:[%s1911_s24 + $0x140] sm:$0xff]  ;;  %v1947_v12 = vld [vmem:[%s1911_s24 + $0x148] sm:$0xff]  ;;  %v1950_v13 = vld [vmem:[%s1911_s24 + $0x150] sm:$0xff] }
  0x82   : >> { %v1953_v14 = vld [vmem:[%s1911_s24 + $0x158] sm:$0xff]  ;;  %v1956_v15 = vld [vmem:[%s1920_s27] sm:$0xff]  ;;  %v1959_v16 = vld [vmem:[%s1920_s27 + $0x8] sm:$0xff] }
  0x83   : >> { %v1962_v17 = vld [vmem:[%s1911_s24 + $0x10] sm:$0xff]  ;;  %v1965_v18 = vld [vmem:[%s1911_s24 + $0x160] sm:$0xff]  ;;  %v1968_v19 = vld [vmem:[%s1911_s24 + $0x168] sm:$0xff]  ;;  %v408_v49 = vsub.f32 %v1932_v7, %v1956_v15  ;;  %v409_v61 = vsub.f32 %v1944_v11, %v1959_v16 }
  0x84   : >> { %v1971_v20 = vld [vmem:[%s1911_s24 + $0x170] sm:$0xff]  ;;  %v1977_v22 = vld [vmem:[%s1920_s27 + $0x108] sm:$0xff]  ;;  %v1983_v24 = vld [vmem:[%s1911_s24 + $0x18] sm:$0xff] }
  0x85   : >> { %3486 = vst [vmem:[#allocation12_spill] sm:$0xff] %v1971_v20  ;;  %v1974_v21 = vld [vmem:[%s1920_s27 + $0x10] sm:$0xff]  ;;  %v1986_v25 = vld [vmem:[%s1911_s24 + $0x178] sm:$0xff]  ;;  %v1989_v26 = vld [vmem:[%s1911_s24 + $0x180] sm:$0xff]  ;;  %v472_v50 = vand.u32 2147483647, %v408_v49 }
  0x86   : >> { %v1980_v23 = vld [vmem:[%s1920_s27 + $0x110] sm:$0xff]  ;;  %v1992_v27 = vld [vmem:[%s1911_s24 + $0x188] sm:$0xff]  ;;  %v1995_v28 = vld [vmem:[%s1920_s27 + $0x18] sm:$0xff]  ;;  %v410_v63 = vsub.f32 %v1962_v17, %v1974_v21  ;;  %v473_v0 = vand.u32 2147483647, %v409_v61 }
  0x87   : >> { %3487 = vst [vmem:[#allocation13_spill] sm:$0xff] %v1992_v27  ;;  %v1998_v29 = vld [vmem:[%s1920_s27 + $0x118] sm:$0xff]  ;;  %v2001_v30 = vld [vmem:[%s1920_s27 + $0x120] sm:$0xff]  ;;  %v2004_v31 = vld [vmem:[%s1920_s27 + $0x128] sm:$0xff]  ;;  %v411_v21 = vsub.f32 %v1983_v24, %v1995_v28 }
  0x88   : >> { %v2011_v34 = vld [vmem:[%s1911_s24 + $0x190] sm:$0xff]  ;;  %v2014_v35 = vld [vmem:[%s1911_s24 + $0x198] sm:$0xff]  ;;  %v2017_v36 = vld [vmem:[%s1911_s24 + $0x1a0] sm:$0xff]  ;;  %v474_v24 = vand.u32 2147483647, %v410_v63 }
  0x89   : >> { %3488 = vst [vmem:[#allocation14_spill] sm:$0xff] %v2017_v36  ;;  %v2020_v37 = vld [vmem:[%s1920_s27 + $0x130] sm:$0xff]  ;;  %v2023_v38 = vld [vmem:[%s1920_s27 + $0x138] sm:$0xff]  ;;  %v2026_v39 = vld [vmem:[%s1920_s27 + $0x140] sm:$0xff] }
  0x8a   : >> { %v2035_v43 = vld [vmem:[%s1911_s24 + $0x1a8] sm:$0xff]  ;;  %v2038_v44 = vld [vmem:[%s1911_s24 + $0x1b0] sm:$0xff]  ;;  %v2041_v45 = vld [vmem:[%s1911_s24 + $0x1b8] sm:$0xff] }
  0x8b   : >> { %3489 = vst [vmem:[#allocation15_spill] sm:$0xff] %v2041_v45  ;;  %v2044_v46 = vld [vmem:[%s1920_s27 + $0x148] sm:$0xff]  ;;  %v2047_v47 = vld [vmem:[%s1920_s27 + $0x150] sm:$0xff]  ;;  %v2050_v48 = vld [vmem:[%s1920_s27 + $0x158] sm:$0xff] }
  0x8c   : >> { %v2061_v53 = vld [vmem:[%s1911_s24 + $0x20] sm:$0xff]  ;;  %v2067_v55 = vld [vmem:[%s1911_s24 + $0x1c8] sm:$0xff]  ;;  %v2070_v56 = vld [vmem:[%s1911_s24 + $0x1d0] sm:$0xff] }
  0x8d   : >> { %v2064_v54 = vld [vmem:[%s1911_s24 + $0x1c0] sm:$0xff]  ;;  %3491 = vst [vmem:[#allocation17_spill] sm:$0xff] %v2067_v55  ;;  %3492 = vst [vmem:[#allocation18_spill] sm:$0xff] %v2070_v56  ;;  %v2079_v59 = vld [vmem:[%s1920_s27 + $0x168] sm:$0xff] }
  0x8e   : >> { %3490 = vst [vmem:[#allocation16_spill] sm:$0xff] %v2064_v54  ;;  %v2073_v57 = vld [vmem:[%s1920_s27 + $0x20] sm:$0xff]  ;;  %3493 = vst [vmem:[#allocation19_spill] sm:$0xff] %v2079_v59  ;;  %v2082_v60 = vld [vmem:[%s1920_s27 + $0x170] sm:$0xff] }
  0x8f   : >> { %v2076_v58 = vld [vmem:[%s1920_s27 + $0x160] sm:$0xff]  ;;  %3494 = vst [vmem:[#allocation20_spill] sm:$0xff] %v2082_v60  ;;  %v2093_v7 = vld [vmem:[%s1911_s24 + $0x1d8] sm:$0xff]  ;;  %v2099_v52 = vld [vmem:[%s1911_s24 + $0x1e8] sm:$0xff] }
  0x90   : >> { %3495 = vst [vmem:[#allocation21_spill] sm:$0xff] %v2093_v7  ;;  %v2096_v15 = vld [vmem:[%s1911_s24 + $0x1e0] sm:$0xff]  ;;  %3497 = vst [vmem:[#allocation23_spill] sm:$0xff] %v2099_v52  ;;  %v2102_v51 = vld [vmem:[%s1920_s27 + $0x178] sm:$0xff]  ;;  %v536_v7 = vadd.f32 %v473_v0, %v472_v50 }
  0x91   : >> { %3496 = vst [vmem:[#allocation22_spill] sm:$0xff] %v2096_v15  ;;  %v2105_v11 = vld [vmem:[%s1920_s27 + $0x180] sm:$0xff]  ;;  %v2108_v16 = vld [vmem:[%s1920_s27 + $0x188] sm:$0xff]  ;;  %v2119_v42 = vld [vmem:[%s1911_s24 + $0x1f0] sm:$0xff] }
  0x92   : >> { %3498 = vst [vmem:[#allocation24_spill] sm:$0xff] %v2105_v11  ;;  %3499 = vst [vmem:[#allocation25_spill] sm:$0xff] %v2108_v16  ;;  %v2122_v41 = vld [vmem:[%s1911_s24 + $0x1f8] sm:$0xff]  ;;  %v2125_v40 = vld [vmem:[%s1920_s27 + $0x190] sm:$0xff]  ;;  %v537_v63 = vadd.f32 %v536_v7, %v474_v24 }
  0x93   : >> { %3500 = vst [vmem:[#allocation26_spill] sm:$0xff] %v2119_v42  ;;  %3501 = vst [vmem:[#allocation27_spill] sm:$0xff] %v2122_v41  ;;  %v2128_v33 = vld [vmem:[%s1920_s27 + $0x198] sm:$0xff]  ;;  %v2131_v17 = vld [vmem:[%s1920_s27 + $0x1a0] sm:$0xff] }
  0x94   : >> { %3502 = vst [vmem:[#allocation28_spill] sm:$0xff] %v2128_v33  ;;  %3503 = vst [vmem:[#allocation29_spill] sm:$0xff] %v2131_v17  ;;  %v284_v32 = vld [vmem:[%s1911_s24 + $0x28] sm:$0xff]  ;;  %v2147_v20 = vld [vmem:[%s1920_s27 + $0x1b0] sm:$0xff]  ;;  %v412_v33 = vsub.f32 %v2061_v53, %v2073_v57 }
  0x95   : >> { %v349_v1 = vld [vmem:[%s1920_s27 + $0x28] sm:$0xff]  ;;  %v2150_v59 = vld [vmem:[%s1920_s27 + $0x1b8] sm:$0xff]  ;;  %v2159_v62 = vld [vmem:[%s1920_s27 + $0x1c0] sm:$0xff] }
  0x96   : >> { %v2144_v60 = vld [vmem:[%s1920_s27 + $0x1a8] sm:$0xff]  ;;  %3504 = vst [vmem:[#allocation30_spill] sm:$0xff] %v2150_v59  ;;  %3505 = vst [vmem:[#allocation31_spill] sm:$0xff] %v2159_v62  ;;  %v2165_v27 = vld [vmem:[%s1920_s27 + $0x1d0] sm:$0xff]  ;;  %v413_v45 = vsub.f32 %v284_v32, %v349_v1  ;;  %v476_v57 = vand.u32 2147483647, %v412_v33 }
  0x97   : >> { %v2162_v16 = vld [vmem:[%s1920_s27 + $0x1c8] sm:$0xff]  ;;  %3507 = vst [vmem:[#allocation33_spill] sm:$0xff] %v2165_v27  ;;  %v2174_v49 = vld [vmem:[%s1920_s27 + $0x1d8] sm:$0xff]  ;;  %v2177_v17 = vld [vmem:[%s1920_s27 + $0x1e0] sm:$0xff] }
  0x98   : >> { %3506 = vst [vmem:[#allocation32_spill] sm:$0xff] %v2162_v16  ;;  %3508 = vst [vmem:[#allocation34_spill] sm:$0xff] %v2174_v49  ;;  %v2180_v36 = vld [vmem:[%s1920_s27 + $0x1e8] sm:$0xff]  ;;  %v2191_v28 = vld [vmem:[%s1920_s27 + $0x1f0] sm:$0xff]  ;;  %v475_v49 = vand.u32 2147483647, %v411_v21 }
  0x99   : >> { %3509 = vst [vmem:[#allocation35_spill] sm:$0xff] %v2177_v17  ;;  %3510 = vst [vmem:[#allocation36_spill] sm:$0xff] %v2180_v36  ;;  %v2194_v59 = vld [vmem:[%s1920_s27 + $0x1f8] sm:$0xff]  ;;  %v285_v11 = vld [vmem:[%s1911_s24 + $0x30] sm:$0xff]  ;;  %v477_v61 = vand.u32 2147483647, %v413_v45 }
  0x9a   : >> { %3511 = vst [vmem:[#allocation37_spill] sm:$0xff] %v2191_v28  ;;  %3512 = vst [vmem:[#allocation38_spill] sm:$0xff] %v2194_v59  ;;  %v350_v16 = vld [vmem:[%s1920_s27 + $0x30] sm:$0xff]  ;;  %v286_v53 = vld [vmem:[%s1911_s24 + $0x38] sm:$0xff]  ;;  %v538_v28 = vadd.f32 %v537_v63, %v475_v49 }
  0x9b   : >> { %v351_v17 = vld [vmem:[%s1920_s27 + $0x38] sm:$0xff]  ;;  %v414_v15 = vsub.f32 %v285_v11, %v350_v16  ;;  %v287_v36 = vld [vmem:[%s1911_s24 + $0x40] sm:$0xff]  ;;  %v288_v42 = vld [vmem:[%s1911_s24 + $0x48] sm:$0xff] }
  0x9c   : >> { %v352_v52 = vld [vmem:[%s1920_s27 + $0x40] sm:$0xff]  ;;  %v415_v56 = vsub.f32 %v286_v53, %v351_v17  ;;  %v353_v1 = vld [vmem:[%s1920_s27 + $0x48] sm:$0xff]  ;;  %v539_v0 = vadd.f32 %v538_v28, %v476_v57  ;;  %v289_v21 = vld [vmem:[%s1911_s24 + $0x50] sm:$0xff] }
  0x9d   : >> { %v416_v32 = vsub.f32 %v287_v36, %v352_v52  ;;  %v478_v50 = vand.u32 2147483647, %v414_v15  ;;  %v354_v11 = vld [vmem:[%s1920_s27 + $0x50] sm:$0xff]  ;;  %v417_v33 = vsub.f32 %v288_v42, %v353_v1  ;;  %v290_v24 = vld [vmem:[%s1911_s24 + $0x58] sm:$0xff]  ;;  %v291_v63 = vld [vmem:[%s1911_s24 + $0x60] sm:$0xff] }
  0x9e   : >> { %v479_v7 = vand.u32 2147483647, %v415_v56  ;;  %v540_v16 = vadd.f32 %v539_v0, %v477_v61  ;;  %v355_v17 = vld [vmem:[%s1920_s27 + $0x58] sm:$0xff]  ;;  %v418_v45 = vsub.f32 %v289_v21, %v354_v11  ;;  %v356_v36 = vld [vmem:[%s1920_s27 + $0x60] sm:$0xff]  ;;  %v292_v57 = vld [vmem:[%s1911_s24 + $0x68] sm:$0xff] }
  0x9f   : >> { %v480_v49 = vand.u32 2147483647, %v416_v32  ;;  %v419_v52 = vsub.f32 %v290_v24, %v355_v17  ;;  %v481_v15 = vand.u32 2147483647, %v417_v33  ;;  %v357_v42 = vld [vmem:[%s1920_s27 + $0x68] sm:$0xff]  ;;  %v420_v56 = vsub.f32 %v291_v63, %v356_v36  ;;  %v293_v0 = vld [vmem:[%s1911_s24 + $0x70] sm:$0xff] }
  0xa0   : >> { %v541_v53 = vadd.f32 %v540_v16, %v478_v50  ;;  %v482_v61 = vand.u32 2147483647, %v418_v45  ;;  %v358_v21 = vld [vmem:[%s1920_s27 + $0x70] sm:$0xff]  ;;  %v421_v32 = vsub.f32 %v292_v57, %v357_v42  ;;  %v294_v16 = vld [vmem:[%s1911_s24 + $0x78] sm:$0xff]  ;;  %v360_v63 = vld [vmem:[%s1920_s27 + $0x80] sm:$0xff] }
  0xa1   : >> { %v483_v50 = vand.u32 2147483647, %v419_v52  ;;  %v359_v24 = vld [vmem:[%s1920_s27 + $0x78] sm:$0xff]  ;;  %v422_v33 = vsub.f32 %v293_v0, %v358_v21  ;;  %v361_v57 = vld [vmem:[%s1920_s27 + $0x88] sm:$0xff]  ;;  %v362_v0 = vld [vmem:[%s1920_s27 + $0x90] sm:$0xff] }
  0xa2   : >> { %v542_v28 = vadd.f32 %v541_v53, %v479_v7  ;;  %v484_v7 = vand.u32 2147483647, %v420_v56  ;;  %v295_v53 = vld [vmem:[%s1911_s24 + $0x80] sm:$0xff]  ;;  %v423_v45 = vsub.f32 %v294_v16, %v359_v24  ;;  %v363_v16 = vld [vmem:[%s1920_s27 + $0x98] sm:$0xff]  ;;  %v374_v27 = vld [vmem:[%s1920_s27 + $0xf0] sm:$0xff] }
  0xa3   : >> { %v424_v52 = vsub.f32 %v295_v53, %v360_v63  ;;  %v364_v53 = vld [vmem:[%s1920_s27 + $0xa0] sm:$0xff] }
  0xa4   : >> { %v543_v1 = vadd.f32 %v542_v28, %v480_v49  ;;  %v485_v49 = vand.u32 2147483647, %v421_v32  ;;  %v296_v28 = vld [vmem:[%s1911_s24 + $0x88] sm:$0xff] }
  0xa5   : >> { %v425_v56 = vsub.f32 %v296_v28, %v361_v57  ;;  %v365_v28 = vld [vmem:[%s1920_s27 + $0xa8] sm:$0xff] }
  0xa6   : >> { %v544_v11 = vadd.f32 %v543_v1, %v481_v15  ;;  %v486_v15 = vand.u32 2147483647, %v422_v33  ;;  %v297_v1 = vld [vmem:[%s1911_s24 + $0x90] sm:$0xff] }
  0xa7   : >> { %v426_v32 = vsub.f32 %v297_v1, %v362_v0  ;;  %v366_v1 = vld [vmem:[%s1920_s27 + $0xb0] sm:$0xff] }
  0xa8   : >> { %v545_v17 = vadd.f32 %v544_v11, %v482_v61  ;;  %v487_v61 = vand.u32 2147483647, %v423_v45  ;;  %v298_v11 = vld [vmem:[%s1911_s24 + $0x98] sm:$0xff] }
  0xa9   : >> { %v427_v33 = vsub.f32 %v298_v11, %v363_v16  ;;  %v367_v11 = vld [vmem:[%s1920_s27 + $0xb8] sm:$0xff] }
  0xaa   : >> { %v546_v36 = vadd.f32 %v545_v17, %v483_v50  ;;  %v488_v50 = vand.u32 2147483647, %v424_v52  ;;  %v299_v17 = vld [vmem:[%s1911_s24 + $0xa0] sm:$0xff] }
  0xab   : >> { %v428_v45 = vsub.f32 %v299_v17, %v364_v53  ;;  %v368_v17 = vld [vmem:[%s1920_s27 + $0xc0] sm:$0xff] }
  0xac   : >> { %v547_v42 = vadd.f32 %v546_v36, %v484_v7  ;;  %v489_v7 = vand.u32 2147483647, %v425_v56  ;;  %v300_v36 = vld [vmem:[%s1911_s24 + $0xa8] sm:$0xff] }
  0xad   : >> { %v429_v52 = vsub.f32 %v300_v36, %v365_v28  ;;  %v369_v36 = vld [vmem:[%s1920_s27 + $0xc8] sm:$0xff] }
  0xae   : >> { %v548_v21 = vadd.f32 %v547_v42, %v485_v49  ;;  %v490_v49 = vand.u32 2147483647, %v426_v32  ;;  %v301_v42 = vld [vmem:[%s1911_s24 + $0xb0] sm:$0xff] }
  0xaf   : >> { %v430_v56 = vsub.f32 %v301_v42, %v366_v1  ;;  %v370_v42 = vld [vmem:[%s1920_s27 + $0xd0] sm:$0xff] }
  0xb0   : >> { %v549_v24 = vadd.f32 %v548_v21, %v486_v15  ;;  %v491_v15 = vand.u32 2147483647, %v427_v33  ;;  %v302_v21 = vld [vmem:[%s1911_s24 + $0xb8] sm:$0xff] }
  0xb1   : >> { %v431_v32 = vsub.f32 %v302_v21, %v367_v11  ;;  %v371_v21 = vld [vmem:[%s1920_s27 + $0xd8] sm:$0xff] }
  0xb2   : >> { %v550_v63 = vadd.f32 %v549_v24, %v487_v61  ;;  %v492_v61 = vand.u32 2147483647, %v428_v45  ;;  %v303_v24 = vld [vmem:[%s1911_s24 + $0xc0] sm:$0xff] }
  0xb3   : >> { %v432_v33 = vsub.f32 %v303_v24, %v368_v17  ;;  %v372_v24 = vld [vmem:[%s1920_s27 + $0xe0] sm:$0xff] }
  0xb4   : >> { %v551_v57 = vadd.f32 %v550_v63, %v488_v50  ;;  %v493_v50 = vand.u32 2147483647, %v429_v52  ;;  %v304_v63 = vld [vmem:[%s1911_s24 + $0xc8] sm:$0xff] }
  0xb5   : >> { %v433_v45 = vsub.f32 %v304_v63, %v369_v36  ;;  %v373_v63 = vld [vmem:[%s1920_s27 + $0xe8] sm:$0xff] }
  0xb6   : >> { %v552_v0 = vadd.f32 %v551_v57, %v489_v7  ;;  %v494_v7 = vand.u32 2147483647, %v430_v56  ;;  %v305_v57 = vld [vmem:[%s1911_s24 + $0xd0] sm:$0xff] }
  0xb7   : >> { %v434_v52 = vsub.f32 %v305_v57, %v370_v42  ;;  %v375_v42 = vld [vmem:[%s1920_s27 + $0xf8] sm:$0xff] }
  0xb8   : >> { %v553_v16 = vadd.f32 %v552_v0, %v490_v49  ;;  %v495_v49 = vand.u32 2147483647, %v431_v32  ;;  %v306_v0 = vld [vmem:[%s1911_s24 + $0xd8] sm:$0xff] }
  0xb9   : >> { %v435_v56 = vsub.f32 %v306_v0, %v371_v21  ;;  %v311_v0 = vld [vmem:[%s1911_s24 + $0x100] sm:$0xff] }
  0xba   : >> { %v554_v53 = vadd.f32 %v553_v16, %v491_v15  ;;  %v496_v15 = vand.u32 2147483647, %v432_v33  ;;  %v307_v16 = vld [vmem:[%s1911_s24 + $0xe0] sm:$0xff] }
  0xbb   : >> { %v436_v32 = vsub.f32 %v307_v16, %v372_v24  ;;  %v499_v57 = vand.u32 2147483647, %v435_v56  ;;  %v3513_v56 = vsub.f32 %v1914_v2, %v1977_v22  ;;  %v3517_v2 = vsub.f32 %v1929_v6, %v2004_v31 }
  0xbc   : >> { %v555_v28 = vadd.f32 %v554_v53, %v492_v61  ;;  %v497_v61 = vand.u32 2147483647, %v433_v45  ;;  %v308_v53 = vld [vmem:[%s1911_s24 + $0xe8] sm:$0xff]  ;;  %v376_v45 = vld [vmem:[%s1920_s27 + $0x100] sm:$0xff]  ;;  %v3521_v6 = vsub.f32 %v1947_v12, %v2044_v46 }
  0xbd   : >> { %v437_v59 = vsub.f32 %v308_v53, %v373_v63  ;;  %v500_v41 = vand.u32 2147483647, %v436_v32  ;;  %v440_v62 = vsub.f32 %v311_v0, %v376_v45  ;;  %v509_v22 = vand.u32 2147483647, %v3517_v2  ;;  %v3525_v45 = vld [vmem:[#allocation19_spill] sm:$0xff] }
  0xbe   : >> { %v556_v1 = vadd.f32 %v555_v28, %v493_v50  ;;  %v498_v50 = vand.u32 2147483647, %v434_v52  ;;  %v309_v28 = vld [vmem:[%s1911_s24 + $0xf0] sm:$0xff]  ;;  %v513_v31 = vand.u32 2147483647, %v3521_v6  ;;  %v3526_v12 = vsub.f32 %v1968_v19, %v3525_v45  ;;  %v3559_v45 = vld [vmem:[#allocation22_spill] sm:$0xff] }
  0xbf   : >> { %v501_v21 = vand.u32 2147483647, %v437_v59  ;;  %v504_v24 = vand.u32 2147483647, %v440_v62  ;;  %v3542_v2 = vsub.f32 %v2035_v43, %v2144_v60 }
  0xc0   : >> { %v557_v11 = vadd.f32 %v556_v1, %v494_v7  ;;  %v310_v7 = vld [vmem:[%s1911_s24 + $0xf8] sm:$0xff]  ;;  %v438_v1 = vsub.f32 %v309_v28, %v374_v27  ;;  %v3514_v27 = vsub.f32 %v1917_v3, %v1980_v23  ;;  %v3518_v3 = vsub.f32 %v1935_v8, %v2020_v37 }
  0xc1   : >> { %v3522_v8 = vsub.f32 %v1950_v13, %v2047_v47  ;;  %v517_v46 = vand.u32 2147483647, %v3526_v12  ;;  %v3560_v12 = vld [vmem:[#allocation35_spill] sm:$0xff] }
  0xc2   : >> { %v558_v17 = vadd.f32 %v557_v11, %v495_v49  ;;  %v439_v49 = vsub.f32 %v310_v7, %v375_v42  ;;  %v502_v54 = vand.u32 2147483647, %v438_v1  ;;  %v506_v63 = vand.u32 2147483647, %v3514_v27 }
  0xc3   : >> { %v510_v23 = vand.u32 2147483647, %v3518_v3  ;;  %v514_v37 = vand.u32 2147483647, %v3522_v8  ;;  %v3536_v27 = vsub.f32 %v2011_v34, %v2125_v40  ;;  %v3543_v34 = vsub.f32 %v2038_v44, %v2147_v20 }
  0xc4   : >> { %v559_v36 = vadd.f32 %v558_v17, %v496_v15  ;;  %v503_v52 = vand.u32 2147483647, %v439_v49 }
  0xc5   : >> { %v526_v40 = vand.u32 2147483647, %v3543_v34 }
  0xc6   : >> { %v560_v33 = vadd.f32 %v559_v36, %v497_v61  ;;  %v505_v61 = vand.u32 2147483647, %v3513_v56  ;;  %v3534_v56 = vld [vmem:[#allocation25_spill] sm:$0xff] }
  0xc8   : >> { %v561_v55 = vadd.f32 %v560_v33, %v498_v50 }
  0xca   : >> { %v562_v11 = vadd.f32 %v561_v55, %v499_v57  ;;  %v3515_v55 = vsub.f32 %v1923_v4, %v1998_v29  ;;  %v3519_v4 = vsub.f32 %v1938_v9, %v2023_v38  ;;  %v3523_v9 = vsub.f32 %v1953_v14, %v2050_v48 }
  0xcb   : >> { %v3530_v14 = vsub.f32 %v1986_v25, %v2102_v51 }
  0xcc   : >> { %v563_v16 = vadd.f32 %v562_v11, %v500_v41  ;;  %v507_v59 = vand.u32 2147483647, %v3515_v55  ;;  %v3516_v41 = vsub.f32 %v1926_v5, %v2001_v30  ;;  %v511_v29 = vand.u32 2147483647, %v3519_v4  ;;  %v3528_v11 = vld [vmem:[#allocation20_spill] sm:$0xff] }
  0xcd   : >> { %v3520_v5 = vsub.f32 %v1941_v10, %v2026_v39  ;;  %v515_v38 = vand.u32 2147483647, %v3523_v9  ;;  %v3524_v10 = vsub.f32 %v1965_v18, %v2076_v58  ;;  %v519_v48 = vand.u32 2147483647, %v3530_v14  ;;  %v3537_v55 = vld [vmem:[#allocation28_spill] sm:$0xff] }
  0xce   : >> { %v564_v15 = vadd.f32 %v563_v16, %v501_v21  ;;  %v508_v62 = vand.u32 2147483647, %v3516_v41  ;;  %v3527_v21 = vld [vmem:[#allocation12_spill] sm:$0xff]  ;;  %v3538_v25 = vsub.f32 %v2014_v35, %v3537_v55  ;;  %v3540_v41 = vld [vmem:[#allocation29_spill] sm:$0xff] }
  0xcf   : >> { %v512_v30 = vand.u32 2147483647, %v3520_v5  ;;  %v516_v39 = vand.u32 2147483647, %v3524_v10  ;;  %v3529_v13 = vsub.f32 %v3527_v21, %v3528_v11  ;;  %v3548_v5 = vld [vmem:[#allocation31_spill] sm:$0xff]  ;;  %v600_v55 = vld [vmem:[%s1895_s21] sm:$0xff] (%p272_p8) }
  0xd0   : >> { %v565_v17 = vadd.f32 %v564_v15, %v502_v54  ;;  %v3531_v15 = vld [vmem:[#allocation24_spill] sm:$0xff]  ;;  %v523_v51 = vand.u32 2147483647, %v3538_v25  ;;  %v3562_v11 = vld [vmem:[#allocation23_spill] sm:$0xff] }
  0xd1   : >> { %v518_v47 = vand.u32 2147483647, %v3529_v13  ;;  %v3532_v18 = vsub.f32 %v1989_v26, %v3531_v15  ;;  %v3563_v13 = vld [vmem:[#allocation36_spill] sm:$0xff] }
  0xd2   : >> { %v566_v53 = vadd.f32 %v565_v17, %v503_v52  ;;  %v3533_v17 = vld [vmem:[#allocation13_spill] sm:$0xff] }
  0xd3   : >> { %v520_v58 = vand.u32 2147483647, %v3532_v18  ;;  %v3535_v19 = vsub.f32 %v3533_v17, %v3534_v56  ;;  %v3569_v17 = vld [vmem:[#allocation38_spill] sm:$0xff] }
  0xd4   : >> { %v567_v32 = vadd.f32 %v566_v53, %v504_v24 }
  0xd6   : >> { %v568_v50 = vadd.f32 %v567_v32, %v505_v61  ;;  %v521_v61 = vand.u32 2147483647, %v3535_v19 }
  0xd8   : >> { %v569_v54 = vadd.f32 %v568_v50, %v506_v63  ;;  %v522_v63 = vand.u32 2147483647, %v3536_v27  ;;  %v3539_v50 = vld [vmem:[#allocation14_spill] sm:$0xff] }
  0xd9   : >> { %v3541_v26 = vsub.f32 %v3539_v50, %v3540_v41 }
  0xda   : >> { %v570_v36 = vadd.f32 %v569_v54, %v507_v59 }
  0xdc   : >> { %v571_v28 = vadd.f32 %v570_v36, %v508_v62  ;;  %v524_v62 = vand.u32 2147483647, %v3541_v26 }
  0xde   : >> { %v572_v57 = vadd.f32 %v571_v28, %v509_v22  ;;  %v525_v22 = vand.u32 2147483647, %v3542_v2  ;;  %v3545_v28 = vld [vmem:[#allocation30_spill] sm:$0xff] }
  0xe0   : >> { %v573_v33 = vadd.f32 %v572_v57, %v510_v23  ;;  %v3544_v23 = vld [vmem:[#allocation15_spill] sm:$0xff]  ;;  %v3547_v57 = vld [vmem:[#allocation16_spill] sm:$0xff] }
  0xe1   : >> { %v3546_v35 = vsub.f32 %v3544_v23, %v3545_v28 }
  0xe2   : >> { %v574_v7 = vadd.f32 %v573_v33, %v511_v29 }
  0xe3   : >> { %v527_v4 = vand.u32 2147483647, %v3546_v35 }
  0xe4   : >> { %v575_v42 = vadd.f32 %v574_v7, %v512_v30  ;;  %v3549_v30 = vsub.f32 %v3547_v57, %v3548_v5  ;;  %v3551_v7 = vld [vmem:[#allocation32_spill] sm:$0xff] }
  0xe6   : >> { %v576_v1 = vadd.f32 %v575_v42, %v513_v31  ;;  %v528_v33 = vand.u32 2147483647, %v3549_v30  ;;  %v3550_v31 = vld [vmem:[#allocation17_spill] sm:$0xff] }
  0xe7   : >> { %v3552_v43 = vsub.f32 %v3550_v31, %v3551_v7  ;;  %v3554_v42 = vld [vmem:[#allocation33_spill] sm:$0xff] }
  0xe8   : >> { %v577_v0 = vadd.f32 %v576_v1, %v514_v37  ;;  %v3553_v37 = vld [vmem:[#allocation18_spill] sm:$0xff] }
  0xe9   : >> { %v529_v60 = vand.u32 2147483647, %v3552_v43  ;;  %v3555_v20 = vsub.f32 %v3553_v37, %v3554_v42  ;;  %v3557_v1 = vld [vmem:[#allocation34_spill] sm:$0xff] }
  0xea   : >> { %v578_v49 = vadd.f32 %v577_v0, %v515_v38  ;;  %v3556_v38 = vld [vmem:[#allocation21_spill] sm:$0xff] }
  0xeb   : >> { %v530_v44 = vand.u32 2147483647, %v3555_v20  ;;  %v3558_v10 = vsub.f32 %v3556_v38, %v3557_v1 }
  0xec   : >> { %v579_v16 = vadd.f32 %v578_v49, %v516_v39 }
  0xed   : >> { %v531_v39 = vand.u32 2147483647, %v3558_v10 }
  0xee   : >> { %v580_v52 = vadd.f32 %v579_v16, %v517_v46  ;;  %v3561_v46 = vsub.f32 %v3559_v45, %v3560_v12 }
  0xf0   : >> { %v581_v24 = vadd.f32 %v580_v52, %v518_v47  ;;  %v532_v49 = vand.u32 2147483647, %v3561_v46  ;;  %v3564_v47 = vsub.f32 %v3562_v11, %v3563_v13  ;;  %v3566_v52 = vld [vmem:[#allocation37_spill] sm:$0xff] }
  0xf2   : >> { %v582_v53 = vadd.f32 %v581_v24, %v519_v48  ;;  %v533_v16 = vand.u32 2147483647, %v3564_v47  ;;  %v3565_v48 = vld [vmem:[#allocation26_spill] sm:$0xff]  ;;  %v3568_v24 = vld [vmem:[#allocation27_spill] sm:$0xff] }
  0xf3   : >> { %v3567_v15 = vsub.f32 %v3565_v48, %v3566_v52  ;;  %v3570_v56 = vsub.f32 %v3568_v24, %v3569_v17 }
  0xf4   : >> { %v583_v32 = vadd.f32 %v582_v53, %v520_v58 }
  0xf5   : >> { %v534_v18 = vand.u32 2147483647, %v3567_v15  ;;  %v535_v19 = vand.u32 2147483647, %v3570_v56 }
  0xf6   : >> { %v584_v59 = vadd.f32 %v583_v32, %v521_v61 }
  0xf8   : >> { %v585_v54 = vadd.f32 %v584_v59, %v522_v63  ;;  %v3571_v63 = vld [vmem:[#allocation11_spill] sm:$0xff] }
  0xfa   : >> { %v586_v36 = vadd.f32 %v585_v54, %v523_v51 }
  0xfc   : >> { %v587_v3 = vadd.f32 %v586_v36, %v524_v62 }
  0xfe   : >> { %v588_v29 = vadd.f32 %v587_v3, %v525_v22 }
 0x100   : >> { %v589_v6 = vadd.f32 %v588_v29, %v526_v40 }
 0x102   : >> { %v590_v8 = vadd.f32 %v589_v6, %v527_v4 }
 0x104   : >> { %v591_v9 = vadd.f32 %v590_v8, %v528_v33 }
 0x106   : >> { %v592_v0 = vadd.f32 %v591_v9, %v529_v60 }
 0x108   : >> { %v593_v21 = vadd.f32 %v592_v0, %v530_v44 }
 0x10a   : >> { %v594_v14 = vadd.f32 %v593_v21, %v531_v39 }
 0x10c   : >> { %v595_v58 = vadd.f32 %v594_v14, %v532_v49 }
 0x10e   : >> { %v596_v61 = vadd.f32 %v595_v58, %v533_v16 }
 0x110   : >> { %v597_v53 = vadd.f32 %v596_v61, %v534_v18 }
 0x112   : >> { %v598_v27 = vadd.f32 %v597_v53, %v535_v19  ;;  %274 = sbr.rel (!%p272_p8) target bundleno = 124 (0x7c), region = 116 }
 0x114   : >> { %v599_v32 = vadd.f32 %v3571_v63, %v598_v27  }
 0x116   : >> { %v3572_v1 = vmov %v599_v32  ;;  %v601_v25 = vadd.f32 (%p272_p8), %v600_v55, %v599_v32 }
 0x118   : > { %602 = vst [vmem:[%s1895_s21] sm:$0xff] %v601_v25 }
 0x119 PF: > { %p1363_p12 = scmp.lt.s32.totalorder %s1658_s15, 1 }
 0x11a   : > { %s2364_s12 = smov (!%p1363_p12), 0  }
 0x11b   : > { %606 = sbr.rel (%p1363_p12) target bundleno = 508 (0x1fc), region = 55 }
 0x120   : > { %v2362_v51 = vmov 0.0  }
 0x121 LB: >> { %3573 = vst [vmem:[#allocation39_spill] sm:$0xff] %v1678_v51  ;;  %s2373_s23 = sshll.u32 %s1682_s12, 9  ;;  %v875_v46 = vlaneseq  ;;  %s1365_s7 = sshll.u32 %s1658_s15, 10  ;;  %s1682_s12 = sphi %s2364_s12, %s612_s12   ;;  %v1678_v51 = vphi %v2362_v51, %v3773_v51  }
 0x122   : >> { %s2377_s19 = scalar_lea.vmem %s1880_s18, %s2373_s23 [#allocation2]  ;;  %s2414_s28 = scalar_lea.vmem %s1886_s26, %s2373_s23 [#allocation5] }
 0x123   : >> { %v2380_v59 = vld [vmem:[%s2377_s19 + $0x108] sm:$0xff]  ;;  %v2383_v50 = vld [vmem:[%s2377_s19 + $0x110] sm:$0xff]  ;;  %v2386_v41 = vld [vmem:[%s2377_s19 + $0x118] sm:$0xff]  ;;  %s874_s8 = sadd.s32 %s1365_s7, %s2373_s23  ;;  %s612_s12 = sadd.s32 1, %s1682_s12  }
 0x124   : >> { %v2389_v26 = vld [vmem:[%s2377_s19 + $0x120] sm:$0xff]  ;;  %v2392_v62 = vld [vmem:[%s2377_s19 + $0x128] sm:$0xff]  ;;  %v2395_v54 = vld [vmem:[%s2377_s19 + $0x130] sm:$0xff]  ;;  %p609_p13 = scmp.ge.s32.totalorder %s612_s12, 2  }
 0x125   : >> { %v2398_v2 = vld [vmem:[%s2377_s19 + $0x138] sm:$0xff]  ;;  %v2401_v22 = vld [vmem:[%s2377_s19 + $0x140] sm:$0xff]  ;;  %v2404_v36 = vld [vmem:[%s2377_s19 + $0x148] sm:$0xff] }
 0x126   : >> { %v2407_v34 = vld [vmem:[%s2377_s19 + $0x150] sm:$0xff]  ;;  %v2410_v40 = vld [vmem:[%s2377_s19 + $0x158] sm:$0xff]  ;;  %v2417_v3 = vld [vmem:[%s2377_s19 + $0x160] sm:$0xff] }
 0x127   : >> { %v2420_v23 = vld [vmem:[%s2377_s19 + $0x168] sm:$0xff]  ;;  %v2423_v28 = vld [vmem:[%s2377_s19 + $0x170] sm:$0xff]  ;;  %v2432_v29 = vld [vmem:[%s2377_s19 + $0x178] sm:$0xff] }
 0x128   : >> { %3574 = vst [vmem:[#allocation40_spill] sm:$0xff] %v2423_v28  ;;  %v2426_v35 = vld [vmem:[%s2414_s28 + $0x108] sm:$0xff]  ;;  %v2429_v4 = vld [vmem:[%s2414_s28 + $0x110] sm:$0xff]  ;;  %3575 = vst [vmem:[#allocation41_spill] sm:$0xff] %v2432_v29 }
 0x129   : >> { %v2435_v57 = vld [vmem:[%s2377_s19 + $0x180] sm:$0xff]  ;;  %v2438_v5 = vld [vmem:[%s2377_s19 + $0x188] sm:$0xff]  ;;  %v2441_v30 = vld [vmem:[%s2414_s28 + $0x118] sm:$0xff] }
 0x12a   : >> { %3576 = vst [vmem:[#allocation42_spill] sm:$0xff] %v2435_v57  ;;  %3577 = vst [vmem:[#allocation43_spill] sm:$0xff] %v2438_v5  ;;  %v2444_v33 = vld [vmem:[%s2414_s28 + $0x120] sm:$0xff]  ;;  %v2447_v6 = vld [vmem:[%s2414_s28 + $0x128] sm:$0xff] }
 0x12b   : >> { %v2454_v43 = vld [vmem:[%s2377_s19 + $0x190] sm:$0xff]  ;;  %v2457_v60 = vld [vmem:[%s2377_s19 + $0x198] sm:$0xff]  ;;  %v2460_v8 = vld [vmem:[%s2377_s19 + $0x1a0] sm:$0xff] }
 0x12c   : >> { %3578 = vst [vmem:[#allocation44_spill] sm:$0xff] %v2454_v43  ;;  %3579 = vst [vmem:[#allocation45_spill] sm:$0xff] %v2457_v60  ;;  %v2463_v37 = vld [vmem:[%s2414_s28 + $0x130] sm:$0xff]  ;;  %v2466_v42 = vld [vmem:[%s2414_s28 + $0x138] sm:$0xff] }
 0x12d   : >> { %3580 = vst [vmem:[#allocation46_spill] sm:$0xff] %v2460_v8  ;;  %v2469_v20 = vld [vmem:[%s2414_s28 + $0x140] sm:$0xff]  ;;  %v2478_v1 = vld [vmem:[%s2377_s19 + $0x1a8] sm:$0xff]  ;;  %v2481_v10 = vld [vmem:[%s2377_s19 + $0x1b0] sm:$0xff] }
 0x12e   : >> { %3581 = vst [vmem:[#allocation47_spill] sm:$0xff] %v2478_v1  ;;  %3582 = vst [vmem:[#allocation48_spill] sm:$0xff] %v2481_v10  ;;  %v2484_v39 = vld [vmem:[%s2377_s19 + $0x1b8] sm:$0xff]  ;;  %v2487_v0 = vld [vmem:[%s2414_s28 + $0x148] sm:$0xff] }
 0x12f   : >> { %3583 = vst [vmem:[#allocation49_spill] sm:$0xff] %v2484_v39  ;;  %v2490_v45 = vld [vmem:[%s2414_s28 + $0x150] sm:$0xff]  ;;  %v2493_v12 = vld [vmem:[%s2414_s28 + $0x158] sm:$0xff]  ;;  %v2502_v11 = vld [vmem:[%s2377_s19 + $0x1c0] sm:$0xff]  ;;  %v2638_v39 = vstv %s874_s8 }
 0x130   : >> { %3584 = vst [vmem:[#allocation50_spill] sm:$0xff] %v2502_v11  ;;  %v2505_v13 = vld [vmem:[%s2377_s19 + $0x1c8] sm:$0xff]  ;;  %v2508_v47 = vld [vmem:[%s2377_s19 + $0x1d0] sm:$0xff]  ;;  %v2511_v16 = vld [vmem:[%s2414_s28 + $0x160] sm:$0xff] }
 0x131   : >> { %3585 = vst [vmem:[#allocation51_spill] sm:$0xff] %v2505_v13  ;;  %3586 = vst [vmem:[#allocation52_spill] sm:$0xff] %v2508_v47  ;;  %v2514_v14 = vld [vmem:[%s2414_s28 + $0x168] sm:$0xff]  ;;  %v2517_v48 = vld [vmem:[%s2414_s28 + $0x170] sm:$0xff] }
 0x132   : >> { %3587 = vst [vmem:[#allocation53_spill] sm:$0xff] %v2517_v48  ;;  %v2526_v58 = vld [vmem:[%s2377_s19 + $0x1d8] sm:$0xff]  ;;  %v2529_v24 = vld [vmem:[%s2377_s19 + $0x1e0] sm:$0xff]  ;;  %v2532_v17 = vld [vmem:[%s2377_s19 + $0x1e8] sm:$0xff] }
 0x133   : >> { %3588 = vst [vmem:[#allocation54_spill] sm:$0xff] %v2526_v58  ;;  %3589 = vst [vmem:[#allocation55_spill] sm:$0xff] %v2529_v24  ;;  %v2535_v56 = vld [vmem:[%s2414_s28 + $0x178] sm:$0xff]  ;;  %v2538_v19 = vld [vmem:[%s2414_s28 + $0x180] sm:$0xff] }
 0x134   : >> { %3590 = vst [vmem:[#allocation56_spill] sm:$0xff] %v2532_v17  ;;  %3591 = vst [vmem:[#allocation57_spill] sm:$0xff] %v2535_v56  ;;  %v2541_v61 = vld [vmem:[%s2414_s28 + $0x188] sm:$0xff]  ;;  %v2550_v32 = vld [vmem:[%s2377_s19 + $0x1f0] sm:$0xff] }
 0x135   : >> { %3592 = vst [vmem:[#allocation58_spill] sm:$0xff] %v2538_v19  ;;  %3593 = vst [vmem:[#allocation59_spill] sm:$0xff] %v2541_v61  ;;  %v2553_v55 = vld [vmem:[%s2377_s19 + $0x1f8] sm:$0xff]  ;;  %v2556_v25 = vld [vmem:[%s2414_s28 + $0x190] sm:$0xff] }
 0x136   : >> { %3594 = vst [vmem:[#allocation60_spill] sm:$0xff] %v2550_v32  ;;  %3595 = vst [vmem:[#allocation61_spill] sm:$0xff] %v2553_v55  ;;  %v2559_v18 = vld [vmem:[%s2414_s28 + $0x198] sm:$0xff]  ;;  %v2562_v15 = vld [vmem:[%s2414_s28 + $0x1a0] sm:$0xff] }
 0x137   : >> { %3596 = vst [vmem:[#allocation62_spill] sm:$0xff] %v2556_v25  ;;  %3597 = vst [vmem:[#allocation63_spill] sm:$0xff] %v2559_v18  ;;  %v2571_v52 = vld [vmem:[%s2414_s28 + $0x1a8] sm:$0xff]  ;;  %v2574_v21 = vld [vmem:[%s2414_s28 + $0x1b0] sm:$0xff] }
 0x138   : >> { %3598 = vst [vmem:[#allocation64_spill] sm:$0xff] %v2562_v15  ;;  %3599 = vst [vmem:[#allocation65_spill] sm:$0xff] %v2571_v52  ;;  %v2577_v49 = vld [vmem:[%s2414_s28 + $0x1b8] sm:$0xff]  ;;  %v2586_v38 = vld [vmem:[%s2414_s28 + $0x1c0] sm:$0xff] }
 0x139   : >> { %3600 = vst [vmem:[#allocation66_spill] sm:$0xff] %v2574_v21  ;;  %3601 = vst [vmem:[#allocation67_spill] sm:$0xff] %v2577_v49  ;;  %v2589_v53 = vld [vmem:[%s2414_s28 + $0x1c8] sm:$0xff]  ;;  %v2592_v9 = vld [vmem:[%s2414_s28 + $0x1d0] sm:$0xff] }
 0x13a   : >> { %3602 = vst [vmem:[#allocation68_spill] sm:$0xff] %v2586_v38  ;;  %3603 = vst [vmem:[#allocation69_spill] sm:$0xff] %v2589_v53  ;;  %v2601_v7 = vld [vmem:[%s2414_s28 + $0x1d8] sm:$0xff]  ;;  %v2604_v63 = vld [vmem:[%s2414_s28 + $0x1e0] sm:$0xff] }
 0x13b   : >> { %3604 = vst [vmem:[#allocation70_spill] sm:$0xff] %v2592_v9  ;;  %3605 = vst [vmem:[#allocation71_spill] sm:$0xff] %v2601_v7  ;;  %v2607_v31 = vld [vmem:[%s2414_s28 + $0x1e8] sm:$0xff]  ;;  %v2616_v21 = vld [vmem:[%s2414_s28 + $0x1f0] sm:$0xff]  ;;  %v2633_v9 = vshrl.u32 %v875_v46, 7 }
 0x13c   : >> { %3606 = vst [vmem:[#allocation72_spill] sm:$0xff] %v2604_v63  ;;  %3607 = vst [vmem:[#allocation73_spill] sm:$0xff] %v2607_v31  ;;  %v2619_v27 = vld [vmem:[%s2414_s28 + $0x1f8] sm:$0xff]  ;;  %v682_v25 = vld [vmem:[%s2414_s28 + $0x8] sm:$0xff] }
 0x13d   : >> { %3608 = vst [vmem:[#allocation74_spill] sm:$0xff] %v2616_v21  ;;  %3609 = vst [vmem:[#allocation75_spill] sm:$0xff] %v2619_v27  ;;  %v909_v47 = vadd.s32 264, %v2633_v9  ;;  %v910_v49 = vadd.s32 272, %v2633_v9  ;;  %v911_v7 = vadd.s32 280, %v2633_v9  ;;  %v912_v51 = vadd.s32 288, %v2633_v9 }
 0x13e   : >> { %3610 = vst [vmem:[#allocation76_spill] sm:$0xff] %v2633_v9  ;;  %3611 = vst [vmem:[#allocation77_spill] sm:$0xff] %v2638_v39  ;;  %v913_v31 = vadd.s32 296, %v2633_v9  ;;  %v914_v15 = vadd.s32 304, %v2633_v9  ;;  %v915_v21 = vadd.s32 312, %v2633_v9  ;;  %v916_v44 = vadd.s32 320, %v2633_v9 }
 0x13f   : >> { %v917_v46 = vadd.s32 328, %v2633_v9  ;;  %v918_v27 = vadd.s32 336, %v2633_v9  ;;  %v919_v55 = vadd.s32 344, %v2633_v9  ;;  %v920_v32 = vadd.s32 352, %v2633_v9 }
 0x140   : >> { %v921_v17 = vadd.s32 360, %v2633_v9  ;;  %v922_v63 = vadd.s32 368, %v2633_v9  ;;  %v2652_v24 = vadd.s32 %v2638_v39, %v909_v47  ;;  %v923_v58 = vadd.s32 376, %v2633_v9  ;;  %v616_v47 = vld [vmem:[%s2377_s19] sm:$0xff] }
 0x141   : >> { %v924_v53 = vadd.s32 384, %v2633_v9  ;;  %v925_v13 = vadd.s32 392, %v2633_v9  ;;  %v2658_v38 = vadd.s32 %v2638_v39, %v910_v49  ;;  %v926_v11 = vadd.s32 400, %v2633_v9 }
 0x142   : >> { %3612 = vst [vmem:[#allocation78_spill] sm:$0xff] %v2652_v24  ;;  %v927_v10 = vadd.s32 408, %v2633_v9  ;;  %v928_v52 = vadd.s32 416, %v2633_v9  ;;  %v2664_v1 = vadd.s32 %v2638_v39, %v911_v7  ;;  %v681_v24 = vld [vmem:[%s2414_s28] sm:$0xff]  ;;  %v929_v8 = vadd.s32 424, %v2633_v9 }
 0x143   : >> { %3613 = vst [vmem:[#allocation79_spill] sm:$0xff] %v2658_v38  ;;  %v930_v18 = vadd.s32 432, %v2633_v9  ;;  %v931_v60 = vadd.s32 440, %v2633_v9  ;;  %v2672_v49 = vadd.s32 %v2638_v39, %v912_v51  ;;  %v617_v38 = vld [vmem:[%s2377_s19 + $0x8] sm:$0xff]  ;;  %v932_v43 = vadd.s32 448, %v2633_v9 }
 0x144   : >> { %3614 = vst [vmem:[#allocation80_spill] sm:$0xff] %v2664_v1  ;;  %v933_v61 = vadd.s32 456, %v2633_v9  ;;  %v934_v7 = vadd.s32 464, %v2633_v9  ;;  %v2680_v1 = vadd.s32 %v2638_v39, %v913_v31  ;;  %v935_v5 = vadd.s32 472, %v2633_v9 }
 0x145   : >> { %3615 = vst [vmem:[#allocation81_spill] sm:$0xff] %v2672_v49  ;;  %v936_v19 = vadd.s32 480, %v2633_v9  ;;  %v937_v51 = vadd.s32 488, %v2633_v9  ;;  %v2686_v49 = vadd.s32 %v2638_v39, %v914_v15  ;;  %v745_v57 = vsub.f32 %v616_v47, %v681_v24 }
 0x146   : >> { %3616 = vst [vmem:[#allocation82_spill] sm:$0xff] %v2680_v1  ;;  %v938_v56 = vadd.s32 496, %v2633_v9  ;;  %v939_v29 = vadd.s32 504, %v2633_v9  ;;  %v2691_v31 = vadd.s32 %v2638_v39, %v915_v21  ;;  %v746_v1 = vsub.f32 %v617_v38, %v682_v25  ;;  %v619_v25 = vld [vmem:[%s2377_s19 + $0x18] sm:$0xff] }
 0x147   : >> { %v2694_v48 = vadd.s32 %v2638_v39, %v916_v44  ;;  %v2697_v28 = vadd.s32 %v2638_v39, %v917_v46  ;;  %v2700_v15 = vadd.s32 %v2638_v39, %v918_v27  ;;  %v2703_v24 = vadd.s32 %v2638_v39, %v919_v55  ;;  %v618_v44 = vld [vmem:[%s2377_s19 + $0x10] sm:$0xff] }
 0x148   : >> { %v2706_v47 = vadd.s32 %v2638_v39, %v920_v32  ;;  %v2709_v21 = vadd.s32 %v2638_v39, %v921_v17  ;;  %v2712_v38 = vadd.s32 %v2638_v39, %v922_v63  ;;  %v2718_v46 = vadd.s32 %v2638_v39, %v923_v58  ;;  %v683_v17 = vld [vmem:[%s2414_s28 + $0x10] sm:$0xff] }
 0x149   : >> { %3617 = vst [vmem:[#allocation83_spill] sm:$0xff] %v2694_v48  ;;  %v620_v48 = vld [vmem:[%s2377_s19 + $0x20] sm:$0xff]  ;;  %v2721_v27 = vadd.s32 %v2638_v39, %v924_v53  ;;  %v2724_v55 = vadd.s32 %v2638_v39, %v925_v13  ;;  %v2727_v32 = vadd.s32 %v2638_v39, %v926_v11  ;;  %v2733_v63 = vadd.s32 %v2638_v39, %v927_v10 }
 0x14a   : >> { %3618 = vst [vmem:[#allocation84_spill] sm:$0xff] %v2706_v47  ;;  %3619 = vst [vmem:[#allocation85_spill] sm:$0xff] %v2709_v21  ;;  %v684_v21 = vld [vmem:[%s2414_s28 + $0x18] sm:$0xff]  ;;  %v685_v47 = vld [vmem:[%s2414_s28 + $0x20] sm:$0xff]  ;;  %v2739_v58 = vadd.s32 %v2638_v39, %v929_v8  ;;  %v2742_v53 = vadd.s32 %v2638_v39, %v930_v18  ;;  %v2745_v13 = vadd.s32 %v2638_v39, %v931_v60 }
 0x14b   : >> { %3620 = vst [vmem:[#allocation86_spill] sm:$0xff] %v2712_v38  ;;  %3621 = vst [vmem:[#allocation87_spill] sm:$0xff] %v2727_v32  ;;  %v2736_v38 = vadd.s32 %v2638_v39, %v928_v52  ;;  %v2748_v11 = vadd.s32 %v2638_v39, %v932_v43  ;;  %v2751_v32 = vadd.s32 %v2638_v39, %v933_v61 }
 0x14c   : >> { %3622 = vst [vmem:[#allocation88_spill] sm:$0xff] %v2745_v13  ;;  %v2754_v10 = vadd.s32 %v2638_v39, %v934_v7  ;;  %v2757_v52 = vadd.s32 %v2638_v39, %v935_v5  ;;  %v2760_v8 = vadd.s32 %v2638_v39, %v936_v19  ;;  %v2763_v18 = vadd.s32 %v2638_v39, %v937_v51 }
 0x14d   : >> { %3623 = vst [vmem:[#allocation89_spill] sm:$0xff] %v2748_v11  ;;  %v2766_v60 = vadd.s32 %v2638_v39, %v938_v56  ;;  %v747_v43 = vsub.f32 %v618_v44, %v683_v17  ;;  %v748_v11 = vsub.f32 %v619_v25, %v684_v21  ;;  %v749_v13 = vsub.f32 %v620_v48, %v685_v47 }
 0x14e   : >> { %3624 = vst [vmem:[#allocation90_spill] sm:$0xff] %v2757_v52  ;;  %3625 = vst [vmem:[#allocation91_spill] sm:$0xff] %v2763_v18  ;;  %v2769_v61 = vadd.s32 %v2638_v39, %v939_v29  ;;  %v877_v7 = vadd.s32 8, %v2633_v9  ;;  %v878_v5 = vadd.s32 16, %v2633_v9  ;;  %v879_v52 = vadd.s32 24, %v2633_v9 }
 0x14f   : >> { %v880_v19 = vadd.s32 32, %v2633_v9  ;;  %v881_v51 = vadd.s32 40, %v2633_v9  ;;  %v2777_v18 = vadd.s32 48, %v2633_v9  ;;  %v2779_v56 = vand.u32 2147483647, %v745_v57 }
 0x150   : >> { %3626 = vst [vmem:[#allocation92_spill] sm:$0xff] %v2769_v61  ;;  %v2781_v21 = vand.u32 2147483647, %v746_v1  ;;  %v2784_v29 = vadd.s32 56, %v2633_v9  ;;  %v2787_v48 = vadd.s32 64, %v2633_v9  ;;  %v3632_v57 = vsub.f32 %v2380_v59, %v2426_v35 }
 0x151   : >> { %3627 = vst [vmem:[#allocation93_spill] sm:$0xff] %v2777_v18  ;;  %v2789_v47 = vand.u32 2147483647, %v747_v43  ;;  %v2791_v44 = vand.u32 2147483647, %v748_v11  ;;  %v3633_v1 = vsub.f32 %v2383_v50, %v2429_v4  ;;  %v3636_v59 = vsub.f32 %v2392_v62, %v2447_v6 }
 0x152   : >> { %3628 = vst [vmem:[#allocation94_spill] sm:$0xff] %v2784_v29  ;;  %3629 = vst [vmem:[#allocation95_spill] sm:$0xff] %v2787_v48  ;;  %v2793_v25 = vand.u32 2147483647, %v749_v13  ;;  %v2798_v17 = vand.u32 2147483647, %v3632_v57  ;;  %v3634_v48 = vsub.f32 %v2386_v41, %v2441_v30  ;;  %v3635_v13 = vsub.f32 %v2389_v26, %v2444_v33 }
 0x153   : >> { %3630 = vst [vmem:[#allocation96_spill] sm:$0xff] %v2791_v44  ;;  %v2803_v29 = vand.u32 2147483647, %v3633_v1  ;;  %v2818_v35 = vand.u32 2147483647, %v3636_v59  ;;  %v3637_v50 = vsub.f32 %v2395_v54, %v2463_v37  ;;  %v3638_v41 = vsub.f32 %v2398_v2, %v2466_v42  ;;  %v2845_v37 = vld [vmem:[%s2377_s19 + $0x28] sm:$0xff] }
 0x154   : >> { %3631 = vst [vmem:[#allocation97_spill] sm:$0xff] %v2793_v25  ;;  %v2808_v43 = vand.u32 2147483647, %v3634_v48  ;;  %v2813_v11 = vand.u32 2147483647, %v3635_v13  ;;  %v3639_v26 = vsub.f32 %v2401_v22, %v2469_v20  ;;  %v3640_v62 = vsub.f32 %v2404_v36, %v2487_v0  ;;  %3641 = vst [vmem:[#allocation98_spill] sm:$0xff] %v2845_v37 }
 0x155   : >> { %v2823_v4 = vand.u32 2147483647, %v3637_v50  ;;  %v2828_v30 = vand.u32 2147483647, %v3638_v41  ;;  %v2842_v54 = vadd.s32 %v2638_v39, %v2633_v9  ;;  %v2848_v48 = vld [vmem:[%s2414_s28 + $0x28] sm:$0xff]  ;;  %v3643_v2 = vsub.f32 %v2407_v34, %v2490_v45  ;;  %v2869_v1 = vld [vmem:[%s2377_s19 + $0x30] sm:$0xff] }
 0x156   : >> { %v2833_v33 = vand.u32 2147483647, %v3639_v26  ;;  %v2838_v6 = vand.u32 2147483647, %v3640_v62  ;;  %3642 = vst [vmem:[#allocation99_spill] sm:$0xff] %v2848_v48  ;;  %v3644_v22 = vsub.f32 %v2410_v40, %v2493_v12  ;;  %v3645_v36 = vsub.f32 %v2417_v3, %v2511_v16  ;;  %3646 = vst [vmem:[#allocation100_spill] sm:$0xff] %v2869_v1 }
 0x157   : >> { %v2853_v42 = vand.u32 2147483647, %v3643_v2  ;;  %v2866_v57 = vadd.s32 %v2638_v39, %v877_v7  ;;  %v2872_v13 = vld [vmem:[%s2414_s28 + $0x30] sm:$0xff]  ;;  %v3648_v34 = vsub.f32 %v2420_v23, %v2514_v14  ;;  %v3649_v40 = vld [vmem:[#allocation40_spill] sm:$0xff]  ;;  %v3650_v12 = vld [vmem:[#allocation53_spill] sm:$0xff]  ;;  %v943_v7 = vadd.s32 %v2638_v39, %v878_v5 }
 0x158   : >> { %v2858_v20 = vand.u32 2147483647, %v3644_v22  ;;  %v2863_v0 = vand.u32 2147483647, %v3645_v36  ;;  %3647 = vst [vmem:[#allocation101_spill] sm:$0xff] %v2872_v13  ;;  %v3651_v59 = vsub.f32 %v3649_v40, %v3650_v12  ;;  %v3652_v3 = vld [vmem:[#allocation41_spill] sm:$0xff] }
 0x159   : >> { %v2877_v45 = vand.u32 2147483647, %v3648_v34  ;;  %v3653_v16 = vld [vmem:[#allocation57_spill] sm:$0xff]  ;;  %v3655_v62 = vld [vmem:[#allocation42_spill] sm:$0xff]  ;;  %v3658_v23 = vld [vmem:[#allocation43_spill] sm:$0xff]  ;;  %vm1005_vm0 = vcmp.lt.s32.totalorder %v2842_v54, 1152 }
 0x15a   : >> { %v2882_v50 = vand.u32 2147483647, %v3651_v59  ;;  %v3654_v41 = vsub.f32 %v3652_v3, %v3653_v16  ;;  %v3656_v2 = vld [vmem:[#allocation58_spill] sm:$0xff]  ;;  %v3659_v14 = vld [vmem:[#allocation59_spill] sm:$0xff]  ;;  %v3662_v40 = vld [vmem:[#allocation44_spill] sm:$0xff]  ;;  %v2906_v3 = vadd.s32 %v2638_v39, %v879_v52  ;;  %vm1006_vm1 = vcmp.lt.s32.totalorder %v2866_v57, 1152 }
 0x15b   : >> { %v3657_v22 = vsub.f32 %v3655_v62, %v3656_v2  ;;  %v3660_v34 = vsub.f32 %v3658_v23, %v3659_v14  ;;  %v3663_v12 = vld [vmem:[#allocation62_spill] sm:$0xff]  ;;  %v3667_v16 = vld [vmem:[#allocation45_spill] sm:$0xff]  ;;  %v3668_v5 = vld [vmem:[#allocation63_spill] sm:$0xff]  ;;  %vm1007_vm2 = vcmp.lt.s32.totalorder %v943_v7, 1152  ;;  %vm1062_vm8 = vcmp.lt.s32.totalorder %v2751_v32, 1152 }
 0x15c   : >> { %v2887_v26 = vand.u32 2147483647, %v3654_v41  ;;  %v3664_v59 = vsub.f32 %v3662_v40, %v3663_v12  ;;  %3666 = vst [vmem:[#allocation41_spill] sm:$0xff] %v2906_v3  ;;  %v3669_v41 = vsub.f32 %v3667_v16, %v3668_v5  ;;  %v3671_v62 = vld [vmem:[#allocation46_spill] sm:$0xff]  ;;  %v3672_v2 = vld [vmem:[#allocation64_spill] sm:$0xff]  ;;  %v3675_v23 = vld [vmem:[#allocation47_spill] sm:$0xff]  ;;  %v2924_v40 = vadd.s32 %v2638_v39, %v880_v19 }
 0x15d   : >> { %v2893_v36 = vand.u32 2147483647, %v3657_v22  ;;  %v2898_v25 = vand.u32 2147483647, %v3660_v34  ;;  %v3673_v22 = vsub.f32 %v3671_v62, %v3672_v2  ;;  %v3676_v14 = vld [vmem:[#allocation65_spill] sm:$0xff]  ;;  %v3679_v52 = vld [vmem:[#allocation48_spill] sm:$0xff] }
 0x15e   : >> { %v2903_v9 = vand.u32 2147483647, %v3664_v59  ;;  %v2911_v44 = vand.u32 2147483647, %v3669_v41  ;;  %v3677_v34 = vsub.f32 %v3675_v23, %v3676_v14  ;;  %3678 = vst [vmem:[#allocation58_spill] sm:$0xff] %v2924_v40  ;;  %v3680_v12 = vld [vmem:[#allocation66_spill] sm:$0xff]  ;;  %v2942_v23 = vadd.s32 %v2638_v39, %v881_v51 }
 0x15f   : >> { %3661 = vst [vmem:[#allocation40_spill] sm:$0xff] %v2898_v25  ;;  %v2916_v18 = vand.u32 2147483647, %v3673_v22  ;;  %v3681_v59 = vsub.f32 %v3679_v52, %v3680_v12  ;;  %v3682_v16 = vld [vmem:[#allocation49_spill] sm:$0xff]  ;;  %v3683_v5 = vld [vmem:[#allocation67_spill] sm:$0xff]  ;;  %v3685_v62 = vld [vmem:[#allocation50_spill] sm:$0xff] }
 0x160   : >> { %3665 = vst [vmem:[#allocation53_spill] sm:$0xff] %v2903_v9  ;;  %3670 = vst [vmem:[#allocation57_spill] sm:$0xff] %v2911_v44  ;;  %v2921_v25 = vand.u32 2147483647, %v3677_v34  ;;  %v3684_v41 = vsub.f32 %v3682_v16, %v3683_v5  ;;  %v3686_v2 = vld [vmem:[#allocation68_spill] sm:$0xff]  ;;  %v3689_v14 = vld [vmem:[#allocation51_spill] sm:$0xff] }
 0x161   : >> { %3674 = vst [vmem:[#allocation42_spill] sm:$0xff] %v2916_v18  ;;  %v2929_v9 = vand.u32 2147483647, %v3681_v59  ;;  %v3687_v22 = vsub.f32 %v3685_v62, %v3686_v2  ;;  %3688 = vst [vmem:[#allocation43_spill] sm:$0xff] %v2942_v23  ;;  %v3690_v34 = vld [vmem:[#allocation69_spill] sm:$0xff]  ;;  %v3692_v59 = vld [vmem:[#allocation52_spill] sm:$0xff] }
 0x162   : >> { %v2934_v44 = vand.u32 2147483647, %v3684_v41  ;;  %v3691_v52 = vsub.f32 %v3689_v14, %v3690_v34  ;;  %v3693_v16 = vld [vmem:[#allocation70_spill] sm:$0xff]  ;;  %v3697_v62 = vld [vmem:[#allocation71_spill] sm:$0xff]  ;;  %v3701_v19 = vld [vmem:[#allocation72_spill] sm:$0xff]  ;;  %vm1008_vm7 = vcmp.lt.s32.totalorder %v2906_v3, 1152 }
 0x163   : >> { %v2939_v18 = vand.u32 2147483647, %v3687_v22  ;;  %v3694_v5 = vsub.f32 %v3692_v59, %v3693_v16  ;;  %v3696_v40 = vld [vmem:[#allocation54_spill] sm:$0xff]  ;;  %v3700_v23 = vld [vmem:[#allocation55_spill] sm:$0xff]  ;;  %v3703_v14 = vld [vmem:[#allocation56_spill] sm:$0xff]  ;;  %vm1063_vm9 = vcmp.lt.s32.totalorder %v2754_v10, 1152 }
 0x164   : >> { %v2949_v12 = vand.u32 2147483647, %v3691_v52  ;;  %v3698_v2 = vsub.f32 %v3696_v40, %v3697_v62  ;;  %v3702_v48 = vsub.f32 %v3700_v23, %v3701_v19  ;;  %v3704_v34 = vld [vmem:[#allocation73_spill] sm:$0xff]  ;;  %v3706_v59 = vld [vmem:[#allocation60_spill] sm:$0xff]  ;;  %v3707_v16 = vld [vmem:[#allocation74_spill] sm:$0xff]  ;;  %vm1065_vm11 = vcmp.lt.s32.totalorder %v2760_v8, 1152 }
 0x165   : >> { %v2954_v41 = vand.u32 2147483647, %v3694_v5  ;;  %v3705_v52 = vsub.f32 %v3703_v14, %v3704_v34  ;;  %v3708_v5 = vsub.f32 %v3706_v59, %v3707_v16  ;;  %v3710_v40 = vld [vmem:[#allocation61_spill] sm:$0xff]  ;;  %v3711_v62 = vld [vmem:[#allocation75_spill] sm:$0xff]  ;;  %v3716_v19 = vld [vmem:[#allocation80_spill] sm:$0xff]  ;;  %vm1067_vm13 = vcmp.lt.s32.totalorder %v2766_v60, 1152 }
 0x166   : >> { %v2959_v22 = vand.u32 2147483647, %v3698_v2  ;;  %v2966_v37 = vand.u32 2147483647, %v3702_v48  ;;  %v3712_v2 = vsub.f32 %v3710_v40, %v3711_v62  ;;  %v3714_v48 = vld [vmem:[#allocation78_spill] sm:$0xff]  ;;  %v3715_v23 = vld [vmem:[#allocation79_spill] sm:$0xff] }
 0x167   : >> { %3695 = vst [vmem:[#allocation59_spill] sm:$0xff] %v2954_v41  ;;  %v2971_v39 = vand.u32 2147483647, %v3705_v52  ;;  %v2976_v41 = vand.u32 2147483647, %v3708_v5  ;;  %vm1038_vm3 = vcmp.lt.s32.totalorder %v3714_v48, 1152 }
 0x168   : >> { %3699 = vst [vmem:[#allocation44_spill] sm:$0xff] %v2959_v22  ;;  %v2981_v22 = vand.u32 2147483647, %v3712_v2  ;;  %vm1039_vm4 = vcmp.lt.s32.totalorder %v3715_v23, 1152  ;;  %vm1040_vm5 = vcmp.lt.s32.totalorder %v3716_v19, 1152  ;;  %v3717_v14 = vld [vmem:[#allocation81_spill] sm:$0xff] }
 0x169   : >> { %3709 = vst [vmem:[#allocation62_spill] sm:$0xff] %v2976_v41  ;;  %v3718_v34 = vld [vmem:[#allocation82_spill] sm:$0xff]  ;;  %v3719_v52 = vld [vmem:[#allocation83_spill] sm:$0xff]  ;;  %v3720_v59 = vld [vmem:[#allocation84_spill] sm:$0xff]  ;;  %vm1068_vm14 = vcmp.lt.s32.totalorder %v2769_v61, 1152  ;;  %v1069_v1 = vsel %vm1005_vm0, %v2779_v56, 0.0 }
 0x16a   : >> { %3713 = vst [vmem:[#allocation45_spill] sm:$0xff] %v2981_v22  ;;  %v3721_v16 = vld [vmem:[#allocation85_spill] sm:$0xff]  ;;  %v3722_v5 = vld [vmem:[#allocation86_spill] sm:$0xff]  ;;  %v3723_v40 = vld [vmem:[#allocation87_spill] sm:$0xff]  ;;  %v1070_v3 = vsel %vm1006_vm1, %v2781_v21, 0.0  ;;  %v1071_v22 = vsel %vm1007_vm2, %v2789_v47, 0.0 }
 0x16b   : >> { %v3724_v62 = vld [vmem:[#allocation88_spill] sm:$0xff]  ;;  %v3725_v2 = vld [vmem:[#allocation89_spill] sm:$0xff]  ;;  %v3726_v51 = vld [vmem:[#allocation90_spill] sm:$0xff]  ;;  %v3028_v41 = vsel %vm1038_vm3, %v2798_v17, 0.0  ;;  %v3033_v61 = vsel %vm1039_vm4, %v2803_v29, 0.0  ;;  %v3038_v56 = vsel %vm1040_vm5, %v2808_v43, 0.0 }
 0x16c   : >> { %vm1060_vm15 = vcmp.lt.s32.totalorder %v3724_v62, 1152  ;;  %vm1061_vm6 = vcmp.lt.s32.totalorder %v3725_v2, 1152  ;;  %vm1064_vm10 = vcmp.lt.s32.totalorder %v3726_v51, 1152  ;;  %v3727_v13 = vld [vmem:[#allocation91_spill] sm:$0xff]  ;;  %vm3728_vm0 = vcmp.lt.s32.totalorder %v3717_v14, 1152  ;;  %v623_v57 = vld [vmem:[%s2377_s19 + $0x38] sm:$0xff] }
 0x16d   : >> { %vm1066_vm12 = vcmp.lt.s32.totalorder %v3727_v13, 1152  ;;  %v3043_v21 = vsel %vm3728_vm0, %v2813_v11, 0.0  ;;  %vm3729_vm1 = vcmp.lt.s32.totalorder %v3718_v34, 1152  ;;  %vm3730_vm2 = vcmp.lt.s32.totalorder %v2686_v49, 1152  ;;  %v689_v7 = vld [vmem:[%s2414_s28 + $0x40] sm:$0xff]  ;;  %v3756_v48 = vld [vmem:[#allocation58_spill] sm:$0xff] }
 0x16e   : >> { %v3048_v47 = vsel %vm3729_vm1, %v2818_v35, 0.0  ;;  %v3053_v29 = vsel %vm3730_vm2, %v2823_v4, 0.0  ;;  %vm3731_vm3 = vcmp.lt.s32.totalorder %v2691_v31, 1152  ;;  %vm3732_vm4 = vcmp.lt.s32.totalorder %v3719_v52, 1152  ;;  %v3759_v19 = vld [vmem:[#allocation98_spill] sm:$0xff]  ;;  %v3760_v60 = vld [vmem:[#allocation99_spill] sm:$0xff] }
 0x16f   : >> { %v3058_v17 = vsel %vm3731_vm3, %v2828_v30, 0.0  ;;  %v3063_v43 = vsel %vm3732_vm4, %v2833_v33, 0.0  ;;  %vm3733_vm5 = vcmp.lt.s32.totalorder %v2697_v28, 1152  ;;  %vm3734_vm0 = vcmp.lt.s32.totalorder %v2700_v15, 1152  ;;  %v3741_v30 = vld [vmem:[#allocation40_spill] sm:$0xff] }
 0x170   : >> { %v3068_v11 = vsel %vm3733_vm5, %v2838_v6, 0.0  ;;  %v3073_v49 = vsel %vm3734_vm0, %v2853_v42, 0.0  ;;  %vm3735_vm1 = vcmp.lt.s32.totalorder %v2703_v24, 1152  ;;  %vm3736_vm2 = vcmp.lt.s32.totalorder %v3720_v59, 1152  ;;  %v3743_v6 = vld [vmem:[#allocation53_spill] sm:$0xff]  ;;  %v3762_v52 = vld [vmem:[#allocation96_spill] sm:$0xff] }
 0x171   : >> { %v3078_v31 = vsel %vm3735_vm1, %v2858_v20, 0.0  ;;  %v3083_v35 = vsel %vm3736_vm2, %v2863_v0, 0.0  ;;  %vm3737_vm3 = vcmp.lt.s32.totalorder %v3721_v16, 1152  ;;  %vm3738_vm4 = vcmp.lt.s32.totalorder %v3722_v5, 1152  ;;  %v3745_v42 = vld [vmem:[#allocation57_spill] sm:$0xff]  ;;  %v625_v5 = vld [vmem:[%s2377_s19 + $0x48] sm:$0xff] }
 0x172   : >> { %v3088_v28 = vsel %vm3737_vm3, %v2877_v45, 0.0  ;;  %v3093_v15 = vsel %vm3738_vm4, %v2882_v50, 0.0  ;;  %vm3739_vm5 = vcmp.lt.s32.totalorder %v2718_v46, 1152  ;;  %vm3740_vm0 = vcmp.lt.s32.totalorder %v2721_v27, 1152  ;;  %v3747_v27 = vld [vmem:[#allocation42_spill] sm:$0xff]  ;;  %v3757_v8 = vld [vmem:[#allocation45_spill] sm:$0xff] }
 0x173   : >> { %v3098_v24 = vsel %vm3739_vm5, %v2887_v26, 0.0  ;;  %v3103_v4 = vsel %vm3740_vm0, %v2893_v36, 0.0  ;;  %vm3742_vm1 = vcmp.lt.s32.totalorder %v2724_v55, 1152  ;;  %vm3744_vm2 = vcmp.lt.s32.totalorder %v3723_v40, 1152  ;;  %v3753_v50 = vld [vmem:[#allocation62_spill] sm:$0xff]  ;;  %v624_v26 = vld [vmem:[%s2377_s19 + $0x40] sm:$0xff] }
 0x174   : >> { %v3108_v33 = vsel %vm3742_vm1, %v3741_v30, 0.0  ;;  %v3113_v54 = vsel %vm3744_vm2, %v3743_v6, 0.0  ;;  %vm3746_vm3 = vcmp.lt.s32.totalorder %v2733_v63, 1152  ;;  %vm3748_vm4 = vcmp.lt.s32.totalorder %v2736_v38, 1152  ;;  %v688_v63 = vld [vmem:[%s2414_s28 + $0x38] sm:$0xff]  ;;  %v3754_v36 = vld [vmem:[#allocation93_spill] sm:$0xff] }
 0x175   : >> { %v3118_v46 = vsel %vm3746_vm3, %v3745_v42, 0.0  ;;  %v3123_v20 = vsel %vm3748_vm4, %v3747_v27, 0.0  ;;  %vm3749_vm5 = vcmp.lt.s32.totalorder %v2739_v58, 1152  ;;  %vm3750_vm0 = vcmp.lt.s32.totalorder %v2742_v53, 1152  ;;  %v690_v40 = vld [vmem:[%s2414_s28 + $0x48] sm:$0xff]  ;;  %v3764_v62 = vld [vmem:[#allocation76_spill] sm:$0xff] }
 0x176   : >> { %v3128_v55 = vsel %vm3749_vm5, %v2921_v25, 0.0  ;;  %v3133_v0 = vsel %vm3750_vm0, %v2929_v9, 0.0  ;;  %v3140_v45 = vsel %vm1060_vm15, %v2934_v44, 0.0  ;;  %v3145_v38 = vsel %vm1061_vm6, %v2939_v18, 0.0  ;;  %v3751_v9 = vld [vmem:[#allocation59_spill] sm:$0xff]  ;;  %v3752_v25 = vld [vmem:[#allocation44_spill] sm:$0xff] }
 0x177   : >> { %v3150_v58 = vsel %vm1062_vm8, %v2949_v12, 0.0  ;;  %v3155_v53 = vsel %vm1063_vm9, %v3751_v9, 0.0  ;;  %v3160_v44 = vsel %vm1064_vm10, %v3752_v25, 0.0  ;;  %v3165_v18 = vsel %vm1065_vm11, %v2966_v37, 0.0  ;;  %v3755_v12 = vld [vmem:[#allocation77_spill] sm:$0xff]  ;;  %v3765_v30 = vld [vmem:[#allocation94_spill] sm:$0xff] }
 0x178   : >> { %v3170_v32 = vsel %vm1066_vm12, %v2971_v39, 0.0  ;;  %v3175_v10 = vsel %vm1067_vm13, %v3753_v50, 0.0  ;;  %v947_v51 = vadd.s32 %v3755_v12, %v3754_v36  ;;  %vm1009_vm6 = vcmp.lt.s32.totalorder %v3756_v48, 1152  ;;  %v3766_v42 = vld [vmem:[#allocation43_spill] sm:$0xff]  ;;  %v3767_v27 = vld [vmem:[#allocation100_spill] sm:$0xff]  ;;  %v3770_v25 = vld [vmem:[#allocation97_spill] sm:$0xff] }
 0x179   : >> { %v3185_v13 = vsel %vm1068_vm14, %v3757_v8, 0.0  ;;  %v1133_v39 = vadd.f32 %v1070_v3, %v1069_v1  ;;  %v752_v23 = vsub.f32 %v623_v57, %v688_v63  ;;  %v3761_v14 = vsub.f32 %v3759_v19, %v3760_v60  ;;  %v3768_v57 = vld [vmem:[#allocation101_spill] sm:$0xff]  ;;  %v626_v36 = vld [vmem:[%s2377_s19 + $0x50] sm:$0xff] }
 0x17a   : >> { %v1072_v16 = vsel %vm1008_vm7, %v3762_v52, 0.0  ;;  %v885_v2 = vadd.s32 72, %v3764_v62  ;;  %v948_v6 = vadd.s32 %v3755_v12, %v3765_v30  ;;  %vm1010_vm8 = vcmp.lt.s32.totalorder %v3766_v42, 1152  ;;  %v691_v48 = vld [vmem:[%s2414_s28 + $0x50] sm:$0xff] }
 0x17b   : >> { %v814_v34 = vand.u32 2147483647, %v3761_v14  ;;  %v1134_v1 = vadd.f32 %v1133_v39, %v1071_v22  ;;  %v753_v3 = vsub.f32 %v624_v26, %v689_v7  ;;  %v3769_v63 = vsub.f32 %v3767_v27, %v3768_v57  ;;  %v3771_v37 = vld [vmem:[#allocation95_spill] sm:$0xff]  ;;  %v627_v7 = vld [vmem:[%s2377_s19 + $0x58] sm:$0xff] }
 0x17c   : >> { %v1073_v50 = vsel %vm1009_vm6, %v3770_v25, 0.0  ;;  %v886_v8 = vadd.s32 80, %v3764_v62  ;;  %v949_v19 = vadd.s32 %v3755_v12, %v3771_v37  ;;  %vm1011_vm7 = vcmp.lt.s32.totalorder %v947_v51, 1152  ;;  %v692_v39 = vld [vmem:[%s2414_s28 + $0x58] sm:$0xff]  ;;  %v693_v25 = vld [vmem:[%s2414_s28 + $0x60] sm:$0xff]  ;;  %v695_v37 = vld [vmem:[%s2414_s28 + $0x70] sm:$0xff] }
 0x17d   : >> { %v815_v9 = vand.u32 2147483647, %v3769_v63  ;;  %v1135_v60 = vadd.f32 %v1134_v1, %v1072_v16  ;;  %v754_v14 = vsub.f32 %v625_v5, %v690_v40  ;;  %v816_v22 = vand.u32 2147483647, %v752_v23  ;;  %v628_v63 = vld [vmem:[%s2377_s19 + $0x60] sm:$0xff]  ;;  %v694_v1 = vld [vmem:[%s2414_s28 + $0x68] sm:$0xff] }
 0x17e   : >> { %v1074_v26 = vsel %vm1010_vm8, %v814_v34, 0.0  ;;  %v887_v52 = vadd.s32 88, %v3764_v62  ;;  %v950_v59 = vadd.s32 %v3755_v12, %v885_v2  ;;  %vm1012_vm9 = vcmp.lt.s32.totalorder %v948_v6, 1152  ;;  %v629_v2 = vld [vmem:[%s2377_s19 + $0x68] sm:$0xff] }
 0x17f   : >> { %v1136_v30 = vadd.f32 %v1135_v60, %v1073_v50  ;;  %v755_v42 = vsub.f32 %v626_v36, %v691_v48  ;;  %v817_v27 = vand.u32 2147483647, %v753_v3  ;;  %v1075_v57 = vsel %vm1011_vm7, %v815_v9, 0.0 }
 0x180   : >> { %v888_v51 = vadd.s32 96, %v3764_v62  ;;  %v951_v23 = vadd.s32 %v3755_v12, %v886_v8  ;;  %vm1013_vm10 = vcmp.lt.s32.totalorder %v949_v19, 1152  ;;  %v756_v16 = vsub.f32 %v627_v7, %v692_v39  ;;  %v630_v8 = vld [vmem:[%s2377_s19 + $0x70] sm:$0xff]  ;;  %v631_v39 = vld [vmem:[%s2377_s19 + $0x78] sm:$0xff] }
 0x181   : >> { %v1137_v34 = vadd.f32 %v1136_v30, %v1074_v26  ;;  %v818_v5 = vand.u32 2147483647, %v754_v14  ;;  %v1076_v40 = vsel %vm1012_vm9, %v816_v22, 0.0  ;;  %v889_v6 = vadd.s32 104, %v3764_v62 }
 0x182   : >> { %v952_v3 = vadd.s32 %v3755_v12, %v887_v52  ;;  %vm1014_vm11 = vcmp.lt.s32.totalorder %v950_v59, 1152  ;;  %v757_v50 = vsub.f32 %v628_v63, %v693_v25  ;;  %v819_v36 = vand.u32 2147483647, %v755_v42  ;;  %v696_v52 = vld [vmem:[%s2414_s28 + $0x78] sm:$0xff]  ;;  %v632_v25 = vld [vmem:[%s2377_s19 + $0x80] sm:$0xff] }
 0x183   : >> { %v1138_v9 = vadd.f32 %v1137_v34, %v1075_v57  ;;  %v1077_v48 = vsel %vm1013_vm10, %v817_v27, 0.0  ;;  %v890_v19 = vadd.s32 112, %v3764_v62  ;;  %v953_v60 = vadd.s32 %v3755_v12, %v888_v51  ;;  %v697_v51 = vld [vmem:[%s2414_s28 + $0x80] sm:$0xff] }
 0x184   : >> { %vm1015_vm12 = vcmp.lt.s32.totalorder %v951_v23, 1152  ;;  %v758_v22 = vsub.f32 %v629_v2, %v694_v1  ;;  %v820_v26 = vand.u32 2147483647, %v756_v16  ;;  %v1078_v7 = vsel %vm1014_vm11, %v818_v5, 0.0  ;;  %v633_v1 = vld [vmem:[%s2377_s19 + $0x88] sm:$0xff] }
 0x185   : >> { %v1139_v14 = vadd.f32 %v1138_v9, %v1076_v40  ;;  %v891_v59 = vadd.s32 120, %v3764_v62  ;;  %v954_v30 = vadd.s32 %v3755_v12, %v889_v6  ;;  %vm1016_vm13 = vcmp.lt.s32.totalorder %v952_v3, 1152  ;;  %v698_v6 = vld [vmem:[%s2414_s28 + $0x88] sm:$0xff] }
 0x186   : >> { %v759_v27 = vsub.f32 %v630_v8, %v695_v37  ;;  %v821_v57 = vand.u32 2147483647, %v757_v50  ;;  %v1079_v63 = vsel %vm1015_vm12, %v819_v36, 0.0  ;;  %v892_v23 = vadd.s32 128, %v3764_v62  ;;  %v634_v37 = vld [vmem:[%s2377_s19 + $0x90] sm:$0xff] }
 0x187   : >> { %v1140_v42 = vadd.f32 %v1139_v14, %v1077_v48  ;;  %v955_v34 = vadd.s32 %v3755_v12, %v890_v19  ;;  %vm1017_vm14 = vcmp.lt.s32.totalorder %v953_v60, 1152  ;;  %v760_v5 = vsub.f32 %v631_v39, %v696_v52  ;;  %v699_v19 = vld [vmem:[%s2414_s28 + $0x90] sm:$0xff]  ;;  %v635_v52 = vld [vmem:[%s2377_s19 + $0x98] sm:$0xff] }
 0x188   : >> { %v822_v40 = vand.u32 2147483647, %v758_v22  ;;  %v1080_v2 = vsel %vm1016_vm13, %v820_v26, 0.0  ;;  %v893_v3 = vadd.s32 136, %v3764_v62  ;;  %v956_v9 = vadd.s32 %v3755_v12, %v891_v59  ;;  %v700_v59 = vld [vmem:[%s2414_s28 + $0x98] sm:$0xff] }
 0x189   : >> { %v1141_v16 = vadd.f32 %v1140_v42, %v1078_v7  ;;  %vm1018_vm15 = vcmp.lt.s32.totalorder %v954_v30, 1152  ;;  %v761_v36 = vsub.f32 %v632_v25, %v697_v51  ;;  %v823_v48 = vand.u32 2147483647, %v759_v27  ;;  %v636_v51 = vld [vmem:[%s2377_s19 + $0xa0] sm:$0xff] }
 0x18a   : >> { %v1081_v8 = vsel %vm1017_vm14, %v821_v57, 0.0  ;;  %v894_v60 = vadd.s32 144, %v3764_v62  ;;  %v957_v14 = vadd.s32 %v3755_v12, %v892_v23  ;;  %vm1019_vm1 = vcmp.lt.s32.totalorder %v955_v34, 1152  ;;  %v701_v23 = vld [vmem:[%s2414_s28 + $0xa0] sm:$0xff] }
 0x18b   : >> { %v1142_v50 = vadd.f32 %v1141_v16, %v1079_v63  ;;  %v762_v26 = vsub.f32 %v633_v1, %v698_v6  ;;  %v824_v7 = vand.u32 2147483647, %v760_v5  ;;  %v1082_v39 = vsel %vm1018_vm15, %v822_v40, 0.0  ;;  %v637_v6 = vld [vmem:[%s2377_s19 + $0xa8] sm:$0xff] }
 0x18c   : >> { %v895_v30 = vadd.s32 152, %v3764_v62  ;;  %v958_v42 = vadd.s32 %v3755_v12, %v893_v3  ;;  %vm1020_vm2 = vcmp.lt.s32.totalorder %v956_v9, 1152  ;;  %v763_v57 = vsub.f32 %v634_v37, %v699_v19  ;;  %v702_v3 = vld [vmem:[%s2414_s28 + $0xa8] sm:$0xff]  ;;  %v638_v19 = vld [vmem:[%s2377_s19 + $0xb0] sm:$0xff] }
 0x18d   : >> { %v1143_v22 = vadd.f32 %v1142_v50, %v1080_v2  ;;  %v825_v63 = vand.u32 2147483647, %v761_v36  ;;  %v1083_v25 = vsel %vm1019_vm1, %v823_v48, 0.0  ;;  %v896_v34 = vadd.s32 160, %v3764_v62 }
 0x18e   : >> { %v959_v16 = vadd.s32 %v3755_v12, %v894_v60  ;;  %vm1021_vm3 = vcmp.lt.s32.totalorder %v957_v14, 1152  ;;  %v764_v40 = vsub.f32 %v635_v52, %v700_v59  ;;  %v826_v2 = vand.u32 2147483647, %v762_v26  ;;  %v703_v60 = vld [vmem:[%s2414_s28 + $0xb0] sm:$0xff]  ;;  %v639_v59 = vld [vmem:[%s2377_s19 + $0xb8] sm:$0xff] }
 0x18f   : >> { %v1144_v27 = vadd.f32 %v1143_v22, %v1081_v8  ;;  %v1084_v1 = vsel %vm1020_vm2, %v824_v7, 0.0  ;;  %v897_v9 = vadd.s32 168, %v3764_v62  ;;  %v960_v50 = vadd.s32 %v3755_v12, %v895_v30  ;;  %v704_v30 = vld [vmem:[%s2414_s28 + $0xb8] sm:$0xff] }
 0x190   : >> { %vm1022_vm4 = vcmp.lt.s32.totalorder %v958_v42, 1152  ;;  %v765_v48 = vsub.f32 %v636_v51, %v701_v23  ;;  %v827_v8 = vand.u32 2147483647, %v763_v57  ;;  %v1085_v37 = vsel %vm1021_vm3, %v825_v63, 0.0  ;;  %v640_v23 = vld [vmem:[%s2377_s19 + $0xc0] sm:$0xff] }
 0x191   : >> { %v1145_v5 = vadd.f32 %v1144_v27, %v1082_v39  ;;  %v898_v14 = vadd.s32 176, %v3764_v62  ;;  %v961_v22 = vadd.s32 %v3755_v12, %v896_v34  ;;  %vm1023_vm5 = vcmp.lt.s32.totalorder %v959_v16, 1152  ;;  %v705_v34 = vld [vmem:[%s2414_s28 + $0xc0] sm:$0xff] }
 0x192   : >> { %v766_v7 = vsub.f32 %v637_v6, %v702_v3  ;;  %v828_v39 = vand.u32 2147483647, %v764_v40  ;;  %v1086_v52 = vsel %vm1022_vm4, %v826_v2, 0.0  ;;  %v899_v42 = vadd.s32 184, %v3764_v62  ;;  %v641_v3 = vld [vmem:[%s2377_s19 + $0xc8] sm:$0xff] }
 0x193   : >> { %v1146_v36 = vadd.f32 %v1145_v5, %v1083_v25  ;;  %v962_v27 = vadd.s32 %v3755_v12, %v897_v9  ;;  %vm1024_vm0 = vcmp.lt.s32.totalorder %v960_v50, 1152  ;;  %v767_v63 = vsub.f32 %v638_v19, %v703_v60  ;;  %v706_v9 = vld [vmem:[%s2414_s28 + $0xc8] sm:$0xff]  ;;  %v642_v60 = vld [vmem:[%s2377_s19 + $0xd0] sm:$0xff] }
 0x194   : >> { %v829_v25 = vand.u32 2147483647, %v765_v48  ;;  %v1087_v51 = vsel %vm1023_vm5, %v827_v8, 0.0  ;;  %v900_v16 = vadd.s32 192, %v3764_v62  ;;  %v963_v5 = vadd.s32 %v3755_v12, %v898_v14  ;;  %v707_v14 = vld [vmem:[%s2414_s28 + $0xd0] sm:$0xff] }
 0x195   : >> { %v1147_v26 = vadd.f32 %v1146_v36, %v1084_v1  ;;  %vm1025_vm6 = vcmp.lt.s32.totalorder %v961_v22, 1152  ;;  %v768_v2 = vsub.f32 %v639_v59, %v704_v30  ;;  %v830_v1 = vand.u32 2147483647, %v766_v7  ;;  %v643_v30 = vld [vmem:[%s2377_s19 + $0xd8] sm:$0xff] }
 0x196   : >> { %v1088_v6 = vsel %vm1024_vm0, %v828_v39, 0.0  ;;  %v901_v50 = vadd.s32 200, %v3764_v62  ;;  %v964_v36 = vadd.s32 %v3755_v12, %v899_v42  ;;  %vm1026_vm8 = vcmp.lt.s32.totalorder %v962_v27, 1152  ;;  %v708_v42 = vld [vmem:[%s2414_s28 + $0xd8] sm:$0xff] }
 0x197   : >> { %v1148_v57 = vadd.f32 %v1147_v26, %v1085_v37  ;;  %v769_v8 = vsub.f32 %v640_v23, %v705_v34  ;;  %v831_v37 = vand.u32 2147483647, %v767_v63  ;;  %v1089_v19 = vsel %vm1025_vm6, %v829_v25, 0.0  ;;  %v644_v34 = vld [vmem:[%s2377_s19 + $0xe0] sm:$0xff] }
 0x198   : >> { %v902_v22 = vadd.s32 208, %v3764_v62  ;;  %v965_v26 = vadd.s32 %v3755_v12, %v900_v16  ;;  %vm1027_vm7 = vcmp.lt.s32.totalorder %v963_v5, 1152  ;;  %v770_v39 = vsub.f32 %v641_v3, %v706_v9  ;;  %v709_v16 = vld [vmem:[%s2414_s28 + $0xe0] sm:$0xff]  ;;  %v645_v9 = vld [vmem:[%s2377_s19 + $0xe8] sm:$0xff] }
 0x199   : >> { %v1149_v40 = vadd.f32 %v1148_v57, %v1086_v52  ;;  %v832_v52 = vand.u32 2147483647, %v768_v2  ;;  %v1090_v59 = vsel %vm1026_vm8, %v830_v1, 0.0  ;;  %v903_v27 = vadd.s32 216, %v3764_v62 }
 0x19a   : >> { %v966_v57 = vadd.s32 %v3755_v12, %v901_v50  ;;  %vm1028_vm9 = vcmp.lt.s32.totalorder %v964_v36, 1152  ;;  %v771_v25 = vsub.f32 %v642_v60, %v707_v14  ;;  %v1091_v23 = vsel %vm1027_vm7, %v831_v37, 0.0  ;;  %v710_v50 = vld [vmem:[%s2414_s28 + $0xe8] sm:$0xff]  ;;  %v646_v14 = vld [vmem:[%s2377_s19 + $0xf0] sm:$0xff] }
 0x19b   : >> { %v1150_v48 = vadd.f32 %v1149_v40, %v1087_v51  ;;  %v833_v51 = vand.u32 2147483647, %v769_v8  ;;  %v904_v5 = vadd.s32 224, %v3764_v62  ;;  %v967_v40 = vadd.s32 %v3755_v12, %v902_v22  ;;  %v711_v22 = vld [vmem:[%s2414_s28 + $0xf0] sm:$0xff] }
 0x19c   : >> { %vm1029_vm10 = vcmp.lt.s32.totalorder %v965_v26, 1152  ;;  %v772_v1 = vsub.f32 %v643_v30, %v708_v42  ;;  %v1092_v3 = vsel %vm1028_vm9, %v832_v52, 0.0  ;;  %v905_v36 = vadd.s32 232, %v3764_v62  ;;  %v647_v42 = vld [vmem:[%s2377_s19 + $0xf8] sm:$0xff] }
 0x19d   : >> { %v1151_v7 = vadd.f32 %v1150_v48, %v1088_v6  ;;  %v834_v6 = vand.u32 2147483647, %v770_v39  ;;  %v968_v48 = vadd.s32 %v3755_v12, %v903_v27  ;;  %vm1030_vm11 = vcmp.lt.s32.totalorder %v966_v57, 1152  ;;  %v712_v27 = vld [vmem:[%s2414_s28 + $0xf8] sm:$0xff] }
 0x19e   : >> { %v773_v37 = vsub.f32 %v644_v34, %v709_v16  ;;  %v1093_v60 = vsel %vm1029_vm10, %v833_v51, 0.0  ;;  %v906_v26 = vadd.s32 240, %v3764_v62  ;;  %vm1031_vm12 = vcmp.lt.s32.totalorder %v967_v40, 1152  ;;  %v648_v16 = vld [vmem:[%s2377_s19 + $0x100] sm:$0xff] }
 0x19f   : >> { %v1152_v63 = vadd.f32 %v1151_v7, %v1089_v19  ;;  %v835_v19 = vand.u32 2147483647, %v771_v25  ;;  %v969_v7 = vadd.s32 %v3755_v12, %v904_v5  ;;  %v774_v52 = vsub.f32 %v645_v9, %v710_v50 }
 0x1a0   : >> { %v1094_v30 = vsel %vm1030_vm11, %v834_v6, 0.0  ;;  %v907_v57 = vadd.s32 248, %v3764_v62  ;;  %vm1032_vm13 = vcmp.lt.s32.totalorder %v968_v48, 1152  ;;  %v775_v51 = vsub.f32 %v646_v14, %v711_v22 }
 0x1a1   : >> { %v1153_v2 = vadd.f32 %v1152_v63, %v1090_v59  ;;  %v836_v59 = vand.u32 2147483647, %v772_v1  ;;  %v970_v63 = vadd.s32 %v3755_v12, %v905_v36  ;;  %v1095_v34 = vsel %vm1031_vm12, %v835_v19, 0.0 }
 0x1a2   : >> { %v908_v5 = vadd.s32 256, %v3764_v62  ;;  %v971_v40 = vadd.s32 %v3755_v12, %v906_v26  ;;  %vm1033_vm14 = vcmp.lt.s32.totalorder %v969_v7, 1152  ;;  %v776_v6 = vsub.f32 %v647_v42, %v712_v27 }
 0x1a3   : >> { %v1154_v8 = vadd.f32 %v1153_v2, %v1091_v23  ;;  %v837_v23 = vand.u32 2147483647, %v773_v37  ;;  %v713_v2 = vld [vmem:[%s2414_s28 + $0x100] sm:$0xff]  ;;  %v1096_v9 = vsel %vm1032_vm13, %v836_v59, 0.0  ;;  %v972_v50 = vadd.s32 %v3755_v12, %v907_v57 }
 0x1a4   : >> { %vm1034_vm15 = vcmp.lt.s32.totalorder %v970_v63, 1152  ;;  %v777_v48 = vsub.f32 %v648_v16, %v713_v2  ;;  %v973_v37 = vadd.s32 %v3755_v12, %v908_v5  ;;  %vm1035_vm1 = vcmp.lt.s32.totalorder %v971_v40, 1152  ;;  %v3772_v40 = vld [vmem:[#allocation39_spill] sm:$0xff] }
 0x1a5   : >> { %v1155_v39 = vadd.f32 %v1154_v8, %v1092_v3  ;;  %v838_v3 = vand.u32 2147483647, %v774_v52  ;;  %v839_v8 = vand.u32 2147483647, %v775_v51  ;;  %v840_v14 = vand.u32 2147483647, %v776_v6 }
 0x1a6   : >> { %vm1036_vm2 = vcmp.lt.s32.totalorder %v972_v50, 1152  ;;  %v841_v26 = vand.u32 2147483647, %v777_v48  ;;  %vm1037_vm3 = vcmp.lt.s32.totalorder %v973_v37, 1152 }
 0x1a7   : >> { %v1156_v25 = vadd.f32 %v1155_v39, %v1093_v60  ;;  %v1097_v60 = vsel %vm1033_vm14, %v837_v23, 0.0  ;;  %v1098_v62 = vsel %vm1034_vm15, %v838_v3, 0.0  ;;  %v1099_v7 = vsel %vm1035_vm1, %v839_v8, 0.0 }
 0x1a8   : >> { %v1100_v52 = vsel %vm1036_vm2, %v840_v14, 0.0 }
 0x1a9   : >> { %v1157_v1 = vadd.f32 %v1156_v25, %v1094_v30  ;;  %v1101_v30 = vsel %vm1037_vm3, %v841_v26, 0.0 }
 0x1ab   : >> { %v1158_v36 = vadd.f32 %v1157_v1, %v1095_v34 }
 0x1ad   : >> { %v1159_v19 = vadd.f32 %v1158_v36, %v1096_v9 }
 0x1af   : >> { %v1160_v22 = vadd.f32 %v1159_v19, %v1097_v60 }
 0x1b1   : >> { %v1161_v39 = vadd.f32 %v1160_v22, %v1098_v62 }
 0x1b3   : >> { %v1162_v59 = vadd.f32 %v1161_v39, %v1099_v7 }
 0x1b5   : >> { %v1163_v42 = vadd.f32 %v1162_v59, %v1100_v52 }
 0x1b7   : >> { %v1164_v27 = vadd.f32 %v1163_v42, %v1101_v30 }
 0x1b9   : >> { %v1165_v57 = vadd.f32 %v1164_v27, %v3028_v41 }
 0x1bb   : >> { %v1166_v63 = vadd.f32 %v1165_v57, %v3033_v61 }
 0x1bd   : >> { %v1167_v12 = vadd.f32 %v1166_v63, %v3038_v56 }
 0x1bf   : >> { %v1168_v25 = vadd.f32 %v1167_v12, %v3043_v21 }
 0x1c1   : >> { %v1169_v51 = vadd.f32 %v1168_v25, %v3048_v47 }
 0x1c3   : >> { %v1170_v23 = vadd.f32 %v1169_v51, %v3053_v29 }
 0x1c5   : >> { %v1171_v34 = vadd.f32 %v1170_v23, %v3058_v17 }
 0x1c7   : >> { %v1172_v16 = vadd.f32 %v1171_v34, %v3063_v43 }
 0x1c9   : >> { %v1173_v2 = vadd.f32 %v1172_v16, %v3068_v11 }
 0x1cb   : >> { %v1174_v5 = vadd.f32 %v1173_v2, %v3073_v49 }
 0x1cd   : >> { %v1175_v41 = vadd.f32 %v1174_v5, %v3078_v31 }
 0x1cf   : >> { %v1176_v61 = vadd.f32 %v1175_v41, %v3083_v35 }
 0x1d1   : >> { %v1177_v56 = vadd.f32 %v1176_v61, %v3088_v28 }
 0x1d3   : >> { %v1178_v21 = vadd.f32 %v1177_v56, %v3093_v15 }
 0x1d5   : >> { %v1179_v47 = vadd.f32 %v1178_v21, %v3098_v24 }
 0x1d7   : >> { %v1180_v29 = vadd.f32 %v1179_v47, %v3103_v4 }
 0x1d9   : >> { %v1181_v17 = vadd.f32 %v1180_v29, %v3108_v33 }
 0x1db   : >> { %v1182_v43 = vadd.f32 %v1181_v17, %v3113_v54 }
 0x1dd   : >> { %v1183_v11 = vadd.f32 %v1182_v43, %v3118_v46 }
 0x1df   : >> { %v1184_v49 = vadd.f32 %v1183_v11, %v3123_v20 }
 0x1e1   : >> { %v1185_v31 = vadd.f32 %v1184_v49, %v3128_v55 }
 0x1e3   : >> { %v1186_v35 = vadd.f32 %v1185_v31, %v3133_v0 }
 0x1e5   : >> { %v1187_v28 = vadd.f32 %v1186_v35, %v3140_v45  ;;  %v1197_v45 = vld [vmem:[%s1895_s21] sm:$0xff] (%p609_p13) }
 0x1e7   : >> { %v1188_v15 = vadd.f32 %v1187_v28, %v3145_v38 }
 0x1e9   : >> { %v1189_v24 = vadd.f32 %v1188_v15, %v3150_v58 }
 0x1eb   : >> { %v1190_v4 = vadd.f32 %v1189_v24, %v3155_v53 }
 0x1ed   : >> { %v1191_v33 = vadd.f32 %v1190_v4, %v3160_v44 }
 0x1ef   : >> { %v1192_v54 = vadd.f32 %v1191_v33, %v3165_v18 }
 0x1f1   : >> { %v1193_v46 = vadd.f32 %v1192_v54, %v3170_v32 }
 0x1f3   : >> { %v1194_v20 = vadd.f32 %v1193_v46, %v3175_v10 }
 0x1f5   : >> { %v1195_v55 = vadd.f32 %v1194_v20, %v3185_v13  ;;  %611 = sbr.rel (!%p609_p13) target bundleno = 289 (0x121), region = 127 }
 0x1f7   : >> { %v1196_v0 = vadd.f32 %v3772_v40, %v1195_v55  }
 0x1f9   : >> { %v3773_v51 = vmov %v1196_v0  ;;  %v1198_v38 = vadd.f32 (%p609_p13), %v1197_v45, %v1196_v0 }
 0x1fb   : > { %1199 = vst [vmem:[%s1895_s21] sm:$0xff] %v1198_v38 }
 0x1fc PF: > { %s1367_s0 = sshll.u32 %s1658_s15, 7  ;;  %s1214_s24 = sshll.u32 %s1895_s21, 4  ;;  %s1215_s24 = int_to_ptr.vmem [resolvable:$true] %s1214_s24 }
 0x1fd   : > { %s1212_s25 = scalar_lea.hbm %s3390_s2, %s1367_s0  ;;  %s1201_s27 = scalar_lea.sflag [#allocation4], %s241_s6 }
 0x1fe   : > { %s1542_s12 = scalar_lea.vmem %s1215_s24, 128  ;;  %s1691_s18 = smov [#allocation7]  }
 0x1ff   : > { %p1543_p0 = scmp.ne.s32.totalorder %s1215_s24, %s1542_s12  ;;  %s1546_s26 = sshll.u32 %s1691_s18, 4  ;;  %s1547_s26 = int_to_ptr.vmem [resolvable:$false] %s1546_s26 }
 0x200   : > { %s1548_s23 = scalar_lea.vmem %s1547_s26, 256  ;;  %p1549_p9 = scmp.lt.s32.totalorder %s1215_s24, %s1547_s26 }
 0x201   : > { %p1544_p4 = pnand %p1543_p0, %p1788_p1  ;;  %p1550_p2 = scmp.lt.s32.totalorder %s1548_s23, %s1542_s12 }
 0x203   : > { %p1545_p7 = pneg %p1544_p4  ;;  %p1551_p3 = por %p1550_p2, %p1549_p9 }
 0x205   : > { %p1552_p5 = pnand %p1551_p3, %p1545_p7 }
 0x207   : > { %1555 = shalt.err (!%p1552_p5)
}
 0x208   : > { %s1556_s15 = scalar_lea.hbm %s1212_s25, 128  ;;  %s1560_s19 = scalar_lea.hbm %s3390_s2, 256 }
 0x209   : > { %p1557_p10 = scmp.ne.s32.totalorder %s1212_s25, %s1556_s15  ;;  %p1561_p8 = scmp.lt.s32.totalorder %s1212_s25, %s3390_s2 }
 0x20a   : > { %p1562_p12 = scmp.lt.s32.totalorder %s1560_s19, %s1556_s15 }
 0x20b   : > { %p1558_p11 = pnand %p1557_p10, %p1788_p1 }
 0x20c   : > { %p1563_p13 = por %p1562_p12, %p1561_p8 }
 0x20d   : > { %p1559_p6 = pneg %p1558_p11 }
 0x20f   : > { %p1564_p0 = pnand %p1563_p13, %p1559_p6 }
 0x211   : > { %1567 = shalt.err (!%p1564_p0)
}
 0x212   : > { %1374 = dma.vmem_to_hbm [thread:$0]  (%p1788_p1), %s1215_s24, 128, %s1212_s25, %s1201_s27  }
 0x213 PF: > { %s1226_s8 = sand.u32 1, %s1634_s9   ;;  %p3774_p4 = scmp.ne.s32.totalorder %s3483_s4, 0 }
 0x214   : > { %p3775_p7 = scmp.ge.s32.totalorder %s1666_s17, 2  ;;  %s1227_s0 = scalar_lea.sflag [#allocation4], %s1226_s8 }
 0x216   : > { %p1377_p9 = pnand %p3775_p7, %p3774_p4 }
 0x218   : > { %p1378_p2 = pneg %p1377_p9 }
 0x21a   : > { %1629 = dma.done.wait (%p1378_p2), %s1227_s0, 128  }
 0x21b   : > { %1631 = vsyncadd (%p1378_p2), %s1227_s0, 4294967168  ;;  %s21_s17 = sadd.s32 1, %s1666_s17   ;;  %s3776_s9 = smov %s1638_s10 }
 0x21c   : > { %p18_p3 = scmp.ge.s32.totalorder %s21_s17, 4   ;;  %s3777_s10 = smov %s1642_s11 }
 0x21d   : > { %s3778_s11 = smov %s1779_s29  ;;  %s3779_s12 = smov %s1650_s13 }
 0x21e   : > { %s3780_s13 = smov %s1654_s14  ;;  %s3781_s14 = smov %s1782_s30 }
 0x21f   : > { %s3782_s15 = smov %s1662_s16  ;;  %s3783_s16 = smov %s3785_s20 }
 0x220   :  { %20 = sbr.rel (!%p18_p3) target bundleno = 12 (0xc), region = 138 }
 0x225   :  { %1232 = vsyncpa [#allocation3], 1 }
 0x226   :  { %1234 = vsyncpa [#allocation3 + $0x1], 1 }
 0x227   :  { %1235 = vsyncpa [#allocation6], 1 }
 0x228   :  { %1237 = vsyncpa [#allocation6 + $0x1], 1 }
 0x229   :  { %1238 = vsyncpa [#allocation4], 1 }
 0x22a   :  { %1240 = vsyncpa [#allocation4 + $0x1], 1 }

</bundles_post_ra>
